<compile_context>
chip_gen: v6e
topology: v6e:2x2x1
jax: 0.10.0
libtpu: 0.0.40
codegen_flags: <defaults>
</compile_context>

<pallas_src>
import math
from functools import partial

import jax
import jax.numpy as jnp
from jax.experimental import pallas as pl
from jax.experimental.pallas import tpu as pltpu

VMEM_LIMIT = 32 * 1024 * 1024   # safe scoped-VMEM budget on v5e/v6e/v7x
LN_EPS = 1e-6


# ----------------------------------------------------------------------------
# Pallas kernels
# ----------------------------------------------------------------------------

def _patch_embed_kernel(x_ref, w_ref, b_ref, o_ref):
    """Patch projection: (num_patches, C*p*p) @ (C*p*p, D) + b  (bf16 MXU, f32 acc)."""
    o_ref[...] = (
        jnp.dot(x_ref[...].astype(jnp.bfloat16), w_ref[...],
                preferred_element_type=jnp.float32)
        + b_ref[...].astype(jnp.float32)
    ).astype(o_ref.dtype)


def _make_block_kernel(num_heads, head_dim, eps):
    """Fully fused transformer block for one batch element (grid=(B,))."""
    C = num_heads * head_dim
    inv_sqrt2 = 1.0 / math.sqrt(2.0)

    def kernel(x_ref, ln1g_ref, ln1b_ref, wqkv_ref, wp_ref, bp_ref,
               ln2g_ref, ln2b_ref, w1_ref, b1_ref, w2_ref, b2_ref, o_ref):
        x = x_ref[0].astype(jnp.float32)                       # (S, C)

        # ---- LN1 (f32) + fused QKV projection (bf16 feeds, f32 accumulate) ----
        mu = jnp.mean(x, axis=-1, keepdims=True)
        var = jnp.mean(jnp.square(x - mu), axis=-1, keepdims=True)
        xn = (x - mu) * jax.lax.rsqrt(var + eps)
        xn = xn * ln1g_ref[...].astype(jnp.float32) + ln1b_ref[...].astype(jnp.float32)
        # attention scale is pre-folded into the q columns of wqkv
        qkv = jnp.dot(xn.astype(jnp.bfloat16), wqkv_ref[...],
                      preferred_element_type=jnp.float32)      # (S, 3C)

        # ---- multi-head attention; accumulate per-head partial projections ----
        proj = None
        for h in range(num_heads):
            lo = h * head_dim
            hi = (h + 1) * head_dim
            qh = qkv[:, lo:hi].astype(jnp.bfloat16)
            kh = qkv[:, C + lo:C + hi].astype(jnp.bfloat16)
            vh = qkv[:, 2 * C + lo:2 * C + hi].astype(jnp.bfloat16)
            s = jax.lax.dot_general(qh, kh, (((1,), (1,)), ((), ())),
                                    preferred_element_type=jnp.float32)   # (S, S)
            s = s - jnp.max(s, axis=-1, keepdims=True)
            p = jnp.exp(s)
            p = p / jnp.sum(p, axis=-1, keepdims=True)          # exact softmax
            ctx = jax.lax.dot_general(p.astype(jnp.bfloat16), vh,
                                      (((1,), (0,)), ((), ())),
                                      preferred_element_type=jnp.float32)  # (S, hd)
            part = jax.lax.dot_general(ctx.astype(jnp.bfloat16),
                                       wp_ref[lo:hi, :],
                                       (((1,), (0,)), ((), ())),
                                       preferred_element_type=jnp.float32)  # (S, C)
            proj = part if proj is None else proj + part

        x1 = x + proj + bp_ref[...].astype(jnp.float32)         # residual 1 (f32)

        # ---- LN2 -> fc1 + exact-erf GELU -> fc2 -> residual 2 ----
        mu2 = jnp.mean(x1, axis=-1, keepdims=True)
        var2 = jnp.mean(jnp.square(x1 - mu2), axis=-1, keepdims=True)
        x1n = (x1 - mu2) * jax.lax.rsqrt(var2 + eps)
        x1n = x1n * ln2g_ref[...].astype(jnp.float32) + ln2b_ref[...].astype(jnp.float32)
        h1 = jnp.dot(x1n.astype(jnp.bfloat16), w1_ref[...],
                     preferred_element_type=jnp.float32) + b1_ref[...].astype(jnp.float32)
        # exact (erf) GELU, matches torch.nn.GELU default
        h1 = 0.5 * h1 * (1.0 + jax.lax.erf(h1 * inv_sqrt2))
        h2 = jnp.dot(h1.astype(jnp.bfloat16), w2_ref[...],
                     preferred_element_type=jnp.float32) + b2_ref[...].astype(jnp.float32)

        o_ref[0] = (x1 + h2).astype(o_ref.dtype)

    return kernel


def _final_ln_kernel(x_ref, g_ref, b_ref, o_ref, *, eps):
    x = x_ref[0].astype(jnp.float32)
    mu = jnp.mean(x, axis=-1, keepdims=True)
    var = jnp.mean(jnp.square(x - mu), axis=-1, keepdims=True)
    o_ref[0] = (
        (x - mu) * jax.lax.rsqrt(var + eps)
        * g_ref[...].astype(jnp.float32) + b_ref[...].astype(jnp.float32)
    ).astype(o_ref.dtype)


# ----------------------------------------------------------------------------
# Pallas wrappers
# ----------------------------------------------------------------------------

def pallas_patch_embed(patches, w_bf16, bias, num_patches):
    """patches: (B*num_patches, C*p*p) f32 -> (B*num_patches, D) f32."""
    M, K = patches.shape
    N = w_bf16.shape[1]
    B = M // num_patches
    return pl.pallas_call(
        _patch_embed_kernel,
        out_shape=jax.ShapeDtypeStruct((M, N), jnp.float32),
        grid=(B,),
        in_specs=[
            pl.BlockSpec((num_patches, K), lambda b: (b, 0)),
            pl.BlockSpec((K, N), lambda b: (0, 0)),
            pl.BlockSpec((1, N), lambda b: (0, 0)),
        ],
        out_specs=pl.BlockSpec((num_patches, N), lambda b: (b, 0)),
        compiler_params=pltpu.CompilerParams(
            dimension_semantics=("parallel",),
            vmem_limit_bytes=VMEM_LIMIT,
        ),
    )(patches, w_bf16, bias)


def pallas_transformer_block(x, bp, num_heads):
    """x: (B, S, C) bf16 residual stream -> (B, S, C) bf16."""
    B, S, C = x.shape
    hd = C // num_heads
    hidden = bp["w1"].shape[1]

    vec = lambda n: pl.BlockSpec((1, n), lambda b: (0, 0))
    mat = lambda r, c: pl.BlockSpec((r, c), lambda b: (0, 0))

    return pl.pallas_call(
        _make_block_kernel(num_heads=num_heads, head_dim=hd, eps=LN_EPS),
        out_shape=jax.ShapeDtypeStruct((B, S, C), jnp.bfloat16),
        grid=(B,),
        in_specs=[
            pl.BlockSpec((1, S, C), lambda b: (b, 0, 0)),   # x
            vec(C), vec(C),                                 # ln1 gamma, beta
            mat(C, 3 * C),                                  # wqkv (scale folded into q)
            mat(C, C), vec(C),                              # proj w, b
            vec(C), vec(C),                                 # ln2 gamma, beta
            mat(C, hidden), vec(hidden),                    # fc1 w, b
            mat(hidden, C), vec(C),                         # fc2 w, b
        ],
        out_specs=pl.BlockSpec((1, S, C), lambda b: (b, 0, 0)),
        compiler_params=pltpu.CompilerParams(
            dimension_semantics=("parallel",),
            vmem_limit_bytes=VMEM_LIMIT,
        ),
    )(x, bp["ln1_g"], bp["ln1_b"], bp["wqkv"], bp["wp"], bp["bp"],
      bp["ln2_g"], bp["ln2_b"], bp["w1"], bp["b1"], bp["w2"], bp["b2"])


def pallas_layernorm(x, g, b, eps=LN_EPS):
    """Final LayerNorm over feature dim. x: (B, S, C) bf16 -> (B, S, C) f32."""
    B, S, C = x.shape
    return pl.pallas_call(
        partial(_final_ln_kernel, eps=eps),
        out_shape=jax.ShapeDtypeStruct((B, S, C), jnp.float32),
        grid=(B,),
        in_specs=[
            pl.BlockSpec((1, S, C), lambda b: (b, 0, 0)),
            pl.BlockSpec((1, C), lambda b: (0, 0)),
            pl.BlockSpec((1, C), lambda b: (0, 0)),
        ],
        out_specs=pl.BlockSpec((1, S, C), lambda b: (b, 0, 0)),
        compiler_params=pltpu.CompilerParams(
            dimension_semantics=("parallel",),
            vmem_limit_bytes=VMEM_LIMIT,
        ),
    )(x, g, b)


# ----------------------------------------------------------------------------
# Parameter construction (mirrors the module's __init__ init scheme)
# ----------------------------------------------------------------------------

def _xavier_uniform(key, fan_in, fan_out):
    limit = math.sqrt(6.0 / (fan_in + fan_out))
    return jax.random.uniform(key, (fan_in, fan_out), jnp.float32, -limit, limit)


def init_params(key, *, in_chans, patch_size, embed_dim, depth, num_heads, mlp_ratio):
    hidden = int(embed_dim * mlp_ratio)
    keys = iter(jax.random.split(key, 4 + 4 * depth))
    params = {}

    patch_in = in_chans * patch_size * patch_size
    val = math.sqrt(6.0 / float(3 * patch_size * patch_size + embed_dim))
    params["patch_w"] = jax.random.uniform(
        next(keys), (patch_in, embed_dim), jnp.float32, -val, val)
    params["patch_b"] = jnp.zeros((1, embed_dim), jnp.float32)

    params["cls_token"] = (
        jax.random.truncated_normal(next(keys), -1.0, 1.0, (1, 1, embed_dim)) * 0.02
    ).astype(jnp.float32)

    blocks = []
    for _ in range(depth):
        bp = {}
        bp["ln1_g"] = jnp.ones((1, embed_dim), jnp.float32)
        bp["ln1_b"] = jnp.zeros((1, embed_dim), jnp.float32)
        vq = math.sqrt(6.0 / float(embed_dim + embed_dim))      # qkv init rule
        bp["qkv_w"] = jax.random.uniform(
            next(keys), (embed_dim, 3 * embed_dim), jnp.float32, -vq, vq)
        # qkv_bias=False in the module -> no qkv bias at all
        bp["proj_w"] = _xavier_uniform(next(keys), embed_dim, embed_dim)
        bp["proj_b"] = jnp.zeros((1, embed_dim), jnp.float32)
        bp["ln2_g"] = jnp.ones((1, embed_dim), jnp.float32)
        bp["ln2_b"] = jnp.zeros((1, embed_dim), jnp.float32)
        bp["fc1_w"] = _xavier_uniform(next(keys), embed_dim, hidden)
        bp["fc1_b"] = jnp.zeros((1, hidden), jnp.float32)
        bp["fc2_w"] = _xavier_uniform(next(keys), hidden, embed_dim)
        bp["fc2_b"] = jnp.zeros((1, embed_dim), jnp.float32)
        blocks.append(bp)
    params["blocks"] = blocks

    params["norm_g"] = jnp.ones((1, embed_dim), jnp.float32)
    params["norm_b"] = jnp.zeros((1, embed_dim), jnp.float32)
    # head: num_classes == 0 -> Identity
    return params


def prepare_params(params, num_heads):
    """One-time transform to kernel-ready params (bf16 weights, scale folded)."""
    prepped = {
        "patch_w": params["patch_w"].astype(jnp.bfloat16),
        "patch_b": params["patch_b"],
        "cls_token": params["cls_token"],
        "norm_g": params["norm_g"],
        "norm_b": params["norm_b"],
        "blocks": [],
    }
    for bp in params["blocks"]:
        C = bp["qkv_w"].shape[0]
        hd = C // num_heads
        scale = hd ** -0.5
        wqkv = jnp.concatenate(
            [bp["qkv_w"][:, :C] * scale, bp["qkv_w"][:, C:]], axis=1
        ).astype(jnp.bfloat16)
        prepped["blocks"].append({
            "ln1_g": bp["ln1_g"], "ln1_b": bp["ln1_b"],
            "wqkv": wqkv,
            "wp": bp["proj_w"].astype(jnp.bfloat16), "bp": bp["proj_b"],
            "ln2_g": bp["ln2_g"], "ln2_b": bp["ln2_b"],
            "w1": bp["fc1_w"].astype(jnp.bfloat16), "b1": bp["fc1_b"],
            "w2": bp["fc2_w"].astype(jnp.bfloat16), "b2": bp["fc2_b"],
        })
    return prepped


def build_2d_sincos_pos_embed(patch_shape, embed_dim, temperature=10000.0):
    h, w = patch_shape
    grid_w = jnp.arange(w, dtype=jnp.float32)
    grid_h = jnp.arange(h, dtype=jnp.float32)
    gw, gh = jnp.meshgrid(grid_w, grid_h, indexing="ij")  # torch.meshgrid default
    assert embed_dim % 4 == 0
    pos_dim = embed_dim // 4
    omega = jnp.arange(pos_dim, dtype=jnp.float32) / pos_dim
    omega = 1.0 / temperature ** omega
    out_w = gw.flatten()[:, None] * omega[None, :]
    out_h = gh.flatten()[:, None] * omega[None, :]
    pos_emb = jnp.concatenate(
        [jnp.sin(out_w), jnp.cos(out_w), jnp.sin(out_h), jnp.cos(out_h)], axis=1
    )[None, :, :]
    pe_token = jnp.zeros((1, 1, embed_dim), jnp.float32)
    return jnp.concatenate([pe_token, pos_emb], axis=1)


# ----------------------------------------------------------------------------
# Forward pass
# ----------------------------------------------------------------------------

def encoder_forward(x, mask, prepped, pos_embed, *, patch_size, num_heads, num_vis):
    """x: NCHW float32; mask: (B, num_patches) bool with num_vis visible per row."""
    B, Cin, H, W = x.shape
    p = patch_size
    hp, wp = H // p, W // p
    num_patches = hp * wp
    embed_dim = prepped["patch_w"].shape[1]

    # patchify (conv stride==kernel) -> (B*num_patches, C*p*p) in (c, kh, kw) order
    patches = (
        x.reshape(B, Cin, hp, p, wp, p)
         .transpose(0, 2, 4, 1, 3, 5)
         .reshape(B * num_patches, Cin * p * p)
    )
    tokens = pallas_patch_embed(patches, prepped["patch_w"], prepped["patch_b"],
                                num_patches)
    tokens = tokens.reshape(B, num_patches, embed_dim)

    cls_tok = jnp.broadcast_to(prepped["cls_token"], (B, 1, embed_dim))
    xt = jnp.concatenate([cls_tok, tokens], axis=1) + pos_embed     # (B, N+1, D)

    # x_vis = x_vis[~mask].reshape(B, -1, C) -> jit-friendly fixed-count gather
    x_cls = xt[:, :1, :]
    x_vis_all = xt[:, 1:, :]
    order = jnp.argsort(mask.astype(jnp.int32), axis=1, stable=True)  # visible first
    vis_idx = order[:, :num_vis]
    x_vis = jnp.take_along_axis(x_vis_all, vis_idx[:, :, None], axis=1)
    xt = jnp.concatenate([x_cls, x_vis], axis=1)                    # (B, 1+Nvis, D)

    # bf16 residual stream between fused block kernels (f32 math stays in-kernel)
    xt = xt.astype(jnp.bfloat16)
    for bp in prepped["blocks"]:
        xt = pallas_transformer_block(xt, bp, num_heads)

    out = pallas_layernorm(xt, prepped["norm_g"], prepped["norm_b"])
    # head: Identity (num_classes=0)
    return out


# ----------------------------------------------------------------------------
# Main
# ----------------------------------------------------------------------------

if __name__ == "__main__":
    # small config consistent with the module (embed_dim lane-friendly, %4 == 0)
    img_size = 32
    patch_size = 8
    in_chans = 3
    embed_dim = 128
    depth = 2
    num_heads = 4
    mlp_ratio = 4.0
    B = 2
    hp = wp = img_size // patch_size
    num_patches = hp * wp   # 16

    key = jax.random.PRNGKey(0)
    k_x, k_param, k_mask = jax.random.split(key, 3)

    x = jax.random.normal(k_x, (B, in_chans, img_size, img_size), jnp.float32)

    # deterministic boolean mask: mask 8 of 16 patches per image (same count/row)
    mask_rows = []
    mkeys = jax.random.split(k_mask, B)
    for b in range(B):
        perm = jax.random.permutation(mkeys[b], num_patches)
        row = jnp.zeros((num_patches,), bool).at[perm[: num_patches // 2]].set(True)
        mask_rows.append(row)
    mask = jnp.stack(mask_rows, axis=0)                        # (B, num_patches) bool
    num_vis = num_patches // 2

    params = init_params(
        k_param,
        in_chans=in_chans,
        patch_size=patch_size,
        embed_dim=embed_dim,
        depth=depth,
        num_heads=num_heads,
        mlp_ratio=mlp_ratio,
    )
    prepped = prepare_params(params, num_heads)   # one-time: bf16 cast + scale fold
    pos_embed = build_2d_sincos_pos_embed((hp, wp), embed_dim)

    fwd = jax.jit(partial(encoder_forward, patch_size=patch_size,
                          num_heads=num_heads, num_vis=num_vis))
    out = fwd(x, mask, prepped, pos_embed)
    out = jax.block_until_ready(out)

    assert out.shape == (B, 1 + num_vis, embed_dim), out.shape
    assert bool(jnp.all(jnp.isfinite(out)))
    print("KERNEL_OK")
</pallas_src>

<mosaic_0001>
module attributes {stable_mosaic.version = 11 : i64} {
  func.func @_patch_embed_kernel(%arg0: i32, %arg1: memref<16x192xf32, #tpu.memory_space<vmem>>, %arg2: memref<192x128xbf16, #tpu.memory_space<vmem>>, %arg3: memref<1x128xf32, #tpu.memory_space<vmem>>, %arg4: memref<16x128xf32, #tpu.memory_space<vmem>>) attributes {dimension_semantics = [#tpu.dimension_semantics<parallel>], iteration_bounds = array<i64: 2>, scalar_prefetch = 0 : i64, scratch_operands = 0 : i64, tpu.core_type = #tpu.core_type<tc>, window_params = [{transform_indices = @transform_0, window_bounds = array<i64: 16, 192>}, {pipeline_mode = #tpu.pipeline_mode<synchronous>, transform_indices = @transform_1, window_bounds = array<i64: 192, 128>}, {pipeline_mode = #tpu.pipeline_mode<synchronous>, transform_indices = @transform_2, window_bounds = array<i64: 1, 128>}, {transform_indices = @transform_3, window_bounds = array<i64: 16, 128>}]} {
    %c0 = arith.constant 0 : index
    %c0_0 = arith.constant 0 : index
    %0 = vector.load %arg1[%c0, %c0_0] : memref<16x192xf32, #tpu.memory_space<vmem>>, vector<16x192xf32>
    %1 = arith.truncf %0 : vector<16x192xf32> to vector<16x192xbf16>
    %c0_1 = arith.constant 0 : index
    %c0_2 = arith.constant 0 : index
    %2 = vector.load %arg2[%c0_1, %c0_2] : memref<192x128xbf16, #tpu.memory_space<vmem>>, vector<192x128xbf16>
    %cst = arith.constant dense<0.000000e+00> : vector<16x128xf32>
    %3 = tpu.matmul %1, %2, %cst {dimension_numbers = #tpu.dot_dimension_numbers<[1], [0], [0], [1], [0, 0, 1, 1], [], []>} : vector<16x192xbf16>, vector<192x128xbf16>, vector<16x128xf32> -> vector<16x128xf32>
    %c0_3 = arith.constant 0 : index
    %c0_4 = arith.constant 0 : index
    %4 = vector.load %arg3[%c0_3, %c0_4] : memref<1x128xf32, #tpu.memory_space<vmem>>, vector<1x128xf32>
    %5 = vector.broadcast %4 : vector<1x128xf32> to vector<16x128xf32>
    %6 = arith.addf %3, %5 : vector<16x128xf32>
    %c0_5 = arith.constant 0 : index
    %c0_6 = arith.constant 0 : index
    %7 = vector.load %arg4[%c0_5, %c0_6] : memref<16x128xf32, #tpu.memory_space<vmem>>, vector<16x128xf32>
    tpu.vector_store %arg4[%c0_5, %c0_6], %6 {strides = array<i32>} : memref<16x128xf32, #tpu.memory_space<vmem>>, vector<16x128xf32>,
    return
  }
  func.func @transform_0(%arg0: i32) -> (i32, i32) {
    %c0_i32 = arith.constant 0 : i32
    %c0_i32_0 = arith.constant 0 : i32
    return %arg0, %c0_i32 : i32, i32
  }
  func.func @transform_1(%arg0: i32) -> (i32, i32) {
    %c0_i32 = arith.constant 0 : i32
    %c0_i32_0 = arith.constant 0 : i32
    %c0_i32_1 = arith.constant 0 : i32
    return %c0_i32, %c0_i32_0 : i32, i32
  }
  func.func @transform_2(%arg0: i32) -> (i32, i32) {
    %c0_i32 = arith.constant 0 : i32
    %c0_i32_0 = arith.constant 0 : i32
    %c0_i32_1 = arith.constant 0 : i32
    return %c0_i32, %c0_i32_0 : i32, i32
  }
  func.func @transform_3(%arg0: i32) -> (i32, i32) {
    %c0_i32 = arith.constant 0 : i32
    %c0_i32_0 = arith.constant 0 : i32
    return %arg0, %c0_i32 : i32, i32
  }
}

module attributes {stable_mosaic.version = 11 : i64} {
  func.func @_final_ln_kernel(%arg0: i32, %arg1: memref<1x9x128xbf16, #tpu.memory_space<vmem>>, %arg2: memref<1x128xf32, #tpu.memory_space<vmem>>, %arg3: memref<1x128xf32, #tpu.memory_space<vmem>>, %arg4: memref<1x9x128xf32, #tpu.memory_space<vmem>>) attributes {dimension_semantics = [#tpu.dimension_semantics<parallel>], iteration_bounds = array<i64: 2>, scalar_prefetch = 0 : i64, scratch_operands = 0 : i64, tpu.core_type = #tpu.core_type<tc>, window_params = [{transform_indices = @transform_0, window_bounds = array<i64: 1, 9, 128>}, {pipeline_mode = #tpu.pipeline_mode<synchronous>, transform_indices = @transform_1, window_bounds = array<i64: 1, 128>}, {pipeline_mode = #tpu.pipeline_mode<synchronous>, transform_indices = @transform_2, window_bounds = array<i64: 1, 128>}, {transform_indices = @transform_3, window_bounds = array<i64: 1, 9, 128>}]} {
    %c0 = arith.constant 0 : index
    %c0_0 = arith.constant 0 : index
    %c0_1 = arith.constant 0 : index
    %0 = vector.load %arg1[%c0, %c0_0, %c0_1] : memref<1x9x128xbf16, #tpu.memory_space<vmem>>, vector<1x9x128xbf16>
    %1 = vector.shape_cast %0 : vector<1x9x128xbf16> to vector<9x128xbf16>
    %2 = arith.extf %1 : vector<9x128xbf16> to vector<9x128xf32>
    %cst = arith.constant dense<0.000000e+00> : vector<9xf32>
    %3 = vector.multi_reduction <add>, %2, %cst [1] : vector<9x128xf32> to vector<9xf32>
    %4 = vector.shape_cast %3 : vector<9xf32> to vector<9x1xf32>
    %cst_2 = arith.constant 1.280000e+02 : f32
    %5 = vector.broadcast %cst_2 : f32 to vector<9x1xf32>
    %6 = arith.divf %4, %5 : vector<9x1xf32>
    %7 = vector.broadcast %6 : vector<9x1xf32> to vector<9x128xf32>
    %8 = arith.subf %2, %7 : vector<9x128xf32>
    %9 = arith.mulf %8, %8 : vector<9x128xf32>
    %cst_3 = arith.constant dense<0.000000e+00> : vector<9xf32>
    %10 = vector.multi_reduction <add>, %9, %cst_3 [1] : vector<9x128xf32> to vector<9xf32>
    %11 = vector.shape_cast %10 : vector<9xf32> to vector<9x1xf32>
    %cst_4 = arith.constant 1.280000e+02 : f32
    %12 = vector.broadcast %cst_4 : f32 to vector<9x1xf32>
    %13 = arith.divf %11, %12 : vector<9x1xf32>
    %14 = vector.broadcast %6 : vector<9x1xf32> to vector<9x128xf32>
    %15 = arith.subf %2, %14 : vector<9x128xf32>
    %cst_5 = arith.constant 9.99999997E-7 : f32
    %16 = vector.broadcast %cst_5 : f32 to vector<9x1xf32>
    %17 = arith.addf %13, %16 : vector<9x1xf32>
    %18 = math.rsqrt %17 : vector<9x1xf32>
    %19 = vector.broadcast %18 : vector<9x1xf32> to vector<9x128xf32>
    %20 = arith.mulf %15, %19 : vector<9x128xf32>
    %c0_6 = arith.constant 0 : index
    %c0_7 = arith.constant 0 : index
    %21 = vector.load %arg2[%c0_6, %c0_7] : memref<1x128xf32, #tpu.memory_space<vmem>>, vector<1x128xf32>
    %22 = vector.broadcast %21 : vector<1x128xf32> to vector<9x128xf32>
    %23 = arith.mulf %20, %22 : vector<9x128xf32>
    %c0_8 = arith.constant 0 : index
    %c0_9 = arith.constant 0 : index
    %24 = vector.load %arg3[%c0_8, %c0_9] : memref<1x128xf32, #tpu.memory_space<vmem>>, vector<1x128xf32>
    %25 = vector.broadcast %24 : vector<1x128xf32> to vector<9x128xf32>
    %26 = arith.addf %23, %25 : vector<9x128xf32>
    %c0_10 = arith.constant 0 : index
    %c0_11 = arith.constant 0 : index
    %c0_12 = arith.constant 0 : index
    %27 = vector.load %arg4[%c0_10, %c0_11, %c0_12] : memref<1x9x128xf32, #tpu.memory_space<vmem>>, vector<1x9x128xf32>
    %28 = vector.shape_cast %27 : vector<1x9x128xf32> to vector<9x128xf32>
    %29 = vector.shape_cast %26 : vector<9x128xf32> to vector<1x9x128xf32>
    tpu.vector_store %arg4[%c0_10, %c0_11, %c0_12], %29 {strides = array<i32>} : memref<1x9x128xf32, #tpu.memory_space<vmem>>, vector<1x9x128xf32>,
    return
  }
  func.func @transform_0(%arg0: i32) -> (i32, i32, i32) {
    %c0_i32 = arith.constant 0 : i32
    %c0_i32_0 = arith.constant 0 : i32
    %c0_i32_1 = arith.constant 0 : i32
    return %arg0, %c0_i32, %c0_i32_0 : i32, i32, i32
  }
  func.func @transform_1(%arg0: i32) -> (i32, i32) {
    %c0_i32 = arith.constant 0 : i32
    %c0_i32_0 = arith.constant 0 : i32
    %c0_i32_1 = arith.constant 0 : i32
    return %c0_i32, %c0_i32_0 : i32, i32
  }
  func.func @transform_2(%arg0: i32) -> (i32, i32) {
    %c0_i32 = arith.constant 0 : i32
    %c0_i32_0 = arith.constant 0 : i32
    %c0_i32_1 = arith.constant 0 : i32
    return %c0_i32, %c0_i32_0 : i32, i32
  }
  func.func @transform_3(%arg0: i32) -> (i32, i32, i32) {
    %c0_i32 = arith.constant 0 : i32
    %c0_i32_0 = arith.constant 0 : i32
    %c0_i32_1 = arith.constant 0 : i32
    return %arg0, %c0_i32, %c0_i32_0 : i32, i32, i32
  }
}

module attributes {stable_mosaic.version = 11 : i64} {
  func.func @kernel(%arg0: i32, %arg1: memref<1x9x128xbf16, #tpu.memory_space<vmem>>, %arg2: memref<1x128xf32, #tpu.memory_space<vmem>>, %arg3: memref<1x128xf32, #tpu.memory_space<vmem>>, %arg4: memref<128x384xbf16, #tpu.memory_space<vmem>>, %arg5: memref<128x128xbf16, #tpu.memory_space<vmem>>, %arg6: memref<1x128xf32, #tpu.memory_space<vmem>>, %arg7: memref<1x128xf32, #tpu.memory_space<vmem>>, %arg8: memref<1x128xf32, #tpu.memory_space<vmem>>, %arg9: memref<128x512xbf16, #tpu.memory_space<vmem>>, %arg10: memref<1x512xf32, #tpu.memory_space<vmem>>, %arg11: memref<512x128xbf16, #tpu.memory_space<vmem>>, %arg12: memref<1x128xf32, #tpu.memory_space<vmem>>, %arg13: memref<1x9x128xbf16, #tpu.memory_space<vmem>>) attributes {dimension_semantics = [#tpu.dimension_semantics<parallel>], iteration_bounds = array<i64: 2>, scalar_prefetch = 0 : i64, scratch_operands = 0 : i64, tpu.core_type = #tpu.core_type<tc>, window_params = [{transform_indices = @transform_0, window_bounds = array<i64: 1, 9, 128>}, {pipeline_mode = #tpu.pipeline_mode<synchronous>, transform_indices = @transform_1, window_bounds = array<i64: 1, 128>}, {pipeline_mode = #tpu.pipeline_mode<synchronous>, transform_indices = @transform_2, window_bounds = array<i64: 1, 128>}, {pipeline_mode = #tpu.pipeline_mode<synchronous>, transform_indices = @transform_3, window_bounds = array<i64: 128, 384>}, {pipeline_mode = #tpu.pipeline_mode<synchronous>, transform_indices = @transform_4, window_bounds = array<i64: 128, 128>}, {pipeline_mode = #tpu.pipeline_mode<synchronous>, transform_indices = @transform_5, window_bounds = array<i64: 1, 128>}, {pipeline_mode = #tpu.pipeline_mode<synchronous>, transform_indices = @transform_6, window_bounds = array<i64: 1, 128>}, {pipeline_mode = #tpu.pipeline_mode<synchronous>, transform_indices = @transform_7, window_bounds = array<i64: 1, 128>}, {pipeline_mode = #tpu.pipeline_mode<synchronous>, transform_indices = @transform_8, window_bounds = array<i64: 128, 512>}, {pipeline_mode = #tpu.pipeline_mode<synchronous>, transform_indices = @transform_9, window_bounds = array<i64: 1, 512>}, {pipeline_mode = #tpu.pipeline_mode<synchronous>, transform_indices = @transform_10, window_bounds = array<i64: 512, 128>}, {pipeline_mode = #tpu.pipeline_mode<synchronous>, transform_indices = @transform_11, window_bounds = array<i64: 1, 128>}, {transform_indices = @transform_12, window_bounds = array<i64: 1, 9, 128>}]} {
    %c0 = arith.constant 0 : index
    %c0_0 = arith.constant 0 : index
    %c0_1 = arith.constant 0 : index
    %0 = vector.load %arg1[%c0, %c0_0, %c0_1] : memref<1x9x128xbf16, #tpu.memory_space<vmem>>, vector<1x9x128xbf16>
    %1 = vector.shape_cast %0 : vector<1x9x128xbf16> to vector<9x128xbf16>
    %2 = arith.extf %1 : vector<9x128xbf16> to vector<9x128xf32>
    %cst = arith.constant dense<0.000000e+00> : vector<9xf32>
    %3 = vector.multi_reduction <add>, %2, %cst [1] : vector<9x128xf32> to vector<9xf32>
    %4 = vector.shape_cast %3 : vector<9xf32> to vector<9x1xf32>
    %cst_2 = arith.constant 1.280000e+02 : f32
    %5 = vector.broadcast %cst_2 : f32 to vector<9x1xf32>
    %6 = arith.divf %4, %5 : vector<9x1xf32>
    %7 = vector.broadcast %6 : vector<9x1xf32> to vector<9x128xf32>
    %8 = arith.subf %2, %7 : vector<9x128xf32>
    %9 = arith.mulf %8, %8 : vector<9x128xf32>
    %cst_3 = arith.constant dense<0.000000e+00> : vector<9xf32>
    %10 = vector.multi_reduction <add>, %9, %cst_3 [1] : vector<9x128xf32> to vector<9xf32>
    %11 = vector.shape_cast %10 : vector<9xf32> to vector<9x1xf32>
    %cst_4 = arith.constant 1.280000e+02 : f32
    %12 = vector.broadcast %cst_4 : f32 to vector<9x1xf32>
    %13 = arith.divf %11, %12 : vector<9x1xf32>
    %14 = vector.broadcast %6 : vector<9x1xf32> to vector<9x128xf32>
    %15 = arith.subf %2, %14 : vector<9x128xf32>
    %cst_5 = arith.constant 9.99999997E-7 : f32
    %16 = vector.broadcast %cst_5 : f32 to vector<9x1xf32>
    %17 = arith.addf %13, %16 : vector<9x1xf32>
    %18 = math.rsqrt %17 : vector<9x1xf32>
    %19 = vector.broadcast %18 : vector<9x1xf32> to vector<9x128xf32>
    %20 = arith.mulf %15, %19 : vector<9x128xf32>
    %c0_6 = arith.constant 0 : index
    %c0_7 = arith.constant 0 : index
    %21 = vector.load %arg2[%c0_6, %c0_7] : memref<1x128xf32, #tpu.memory_space<vmem>>, vector<1x128xf32>
    %22 = vector.broadcast %21 : vector<1x128xf32> to vector<9x128xf32>
    %23 = arith.mulf %20, %22 : vector<9x128xf32>
    %c0_8 = arith.constant 0 : index
    %c0_9 = arith.constant 0 : index
    %24 = vector.load %arg3[%c0_8, %c0_9] : memref<1x128xf32, #tpu.memory_space<vmem>>, vector<1x128xf32>
    %25 = vector.broadcast %24 : vector<1x128xf32> to vector<9x128xf32>
    %26 = arith.addf %23, %25 : vector<9x128xf32>
    %27 = arith.truncf %26 : vector<9x128xf32> to vector<9x128xbf16>
    %c0_10 = arith.constant 0 : index
    %c0_11 = arith.constant 0 : index
    %28 = vector.load %arg4[%c0_10, %c0_11] : memref<128x384xbf16, #tpu.memory_space<vmem>>, vector<128x384xbf16>
    %cst_12 = arith.constant dense<0.000000e+00> : vector<9x384xf32>
    %29 = tpu.matmul %27, %28, %cst_12 {dimension_numbers = #tpu.dot_dimension_numbers<[1], [0], [0], [1], [0, 0, 1, 1], [], []>} : vector<9x128xbf16>, vector<128x384xbf16>, vector<9x384xf32> -> vector<9x384xf32>
    %30 = vector.extract_strided_slice %29 {offsets = [0, 0], sizes = [9, 32], strides = [1, 1]} : vector<9x384xf32> to vector<9x32xf32>
    %31 = arith.truncf %30 : vector<9x32xf32> to vector<9x32xbf16>
    %32 = vector.extract_strided_slice %29 {offsets = [0, 128], sizes = [9, 32], strides = [1, 1]} : vector<9x384xf32> to vector<9x32xf32>
    %33 = arith.truncf %32 : vector<9x32xf32> to vector<9x32xbf16>
    %34 = vector.extract_strided_slice %29 {offsets = [0, 256], sizes = [9, 32], strides = [1, 1]} : vector<9x384xf32> to vector<9x32xf32>
    %35 = arith.truncf %34 : vector<9x32xf32> to vector<9x32xbf16>
    %cst_13 = arith.constant dense<0.000000e+00> : vector<9x9xf32>
    %36 = tpu.matmul %31, %33, %cst_13 {dimension_numbers = #tpu.dot_dimension_numbers<[1], [1], [0], [0], [0, 0, 1, 0], [], []>} : vector<9x32xbf16>, vector<9x32xbf16>, vector<9x9xf32> -> vector<9x9xf32>
    %cst_14 = arith.constant dense<0xFF800000> : vector<9xf32>
    %37 = vector.multi_reduction <maximumf>, %36, %cst_14 [1] : vector<9x9xf32> to vector<9xf32>
    %38 = vector.shape_cast %37 : vector<9xf32> to vector<9x1xf32>
    %39 = vector.broadcast %38 : vector<9x1xf32> to vector<9x9xf32>
    %40 = arith.subf %36, %39 : vector<9x9xf32>
    %41 = math.exp %40 : vector<9x9xf32>
    %cst_15 = arith.constant dense<0.000000e+00> : vector<9xf32>
    %42 = vector.multi_reduction <add>, %41, %cst_15 [1] : vector<9x9xf32> to vector<9xf32>
    %43 = vector.shape_cast %42 : vector<9xf32> to vector<9x1xf32>
    %44 = vector.broadcast %43 : vector<9x1xf32> to vector<9x9xf32>
    %45 = arith.divf %41, %44 : vector<9x9xf32>
    %46 = arith.truncf %45 : vector<9x9xf32> to vector<9x9xbf16>
    %cst_16 = arith.constant dense<0.000000e+00> : vector<9x32xf32>
    %47 = tpu.matmul %46, %35, %cst_16 {dimension_numbers = #tpu.dot_dimension_numbers<[1], [0], [0], [1], [0, 0, 1, 1], [], []>} : vector<9x9xbf16>, vector<9x32xbf16>, vector<9x32xf32> -> vector<9x32xf32>
    %48 = arith.truncf %47 : vector<9x32xf32> to vector<9x32xbf16>
    %c0_17 = arith.constant 0 : index
    %c0_18 = arith.constant 0 : index
    %49 = vector.load %arg5[%c0_17, %c0_18] : memref<128x128xbf16, #tpu.memory_space<vmem>>, vector<32x128xbf16>
    %cst_19 = arith.constant dense<0.000000e+00> : vector<9x128xf32>
    %50 = tpu.matmul %48, %49, %cst_19 {dimension_numbers = #tpu.dot_dimension_numbers<[1], [0], [0], [1], [0, 0, 1, 1], [], []>} : vector<9x32xbf16>, vector<32x128xbf16>, vector<9x128xf32> -> vector<9x128xf32>
    %51 = vector.extract_strided_slice %29 {offsets = [0, 32], sizes = [9, 32], strides = [1, 1]} : vector<9x384xf32> to vector<9x32xf32>
    %52 = arith.truncf %51 : vector<9x32xf32> to vector<9x32xbf16>
    %53 = vector.extract_strided_slice %29 {offsets = [0, 160], sizes = [9, 32], strides = [1, 1]} : vector<9x384xf32> to vector<9x32xf32>
    %54 = arith.truncf %53 : vector<9x32xf32> to vector<9x32xbf16>
    %55 = vector.extract_strided_slice %29 {offsets = [0, 288], sizes = [9, 32], strides = [1, 1]} : vector<9x384xf32> to vector<9x32xf32>
    %56 = arith.truncf %55 : vector<9x32xf32> to vector<9x32xbf16>
    %cst_20 = arith.constant dense<0.000000e+00> : vector<9x9xf32>
    %57 = tpu.matmul %52, %54, %cst_20 {dimension_numbers = #tpu.dot_dimension_numbers<[1], [1], [0], [0], [0, 0, 1, 0], [], []>} : vector<9x32xbf16>, vector<9x32xbf16>, vector<9x9xf32> -> vector<9x9xf32>
    %cst_21 = arith.constant dense<0xFF800000> : vector<9xf32>
    %58 = vector.multi_reduction <maximumf>, %57, %cst_21 [1] : vector<9x9xf32> to vector<9xf32>
    %59 = vector.shape_cast %58 : vector<9xf32> to vector<9x1xf32>
    %60 = vector.broadcast %59 : vector<9x1xf32> to vector<9x9xf32>
    %61 = arith.subf %57, %60 : vector<9x9xf32>
    %62 = math.exp %61 : vector<9x9xf32>
    %cst_22 = arith.constant dense<0.000000e+00> : vector<9xf32>
    %63 = vector.multi_reduction <add>, %62, %cst_22 [1] : vector<9x9xf32> to vector<9xf32>
    %64 = vector.shape_cast %63 : vector<9xf32> to vector<9x1xf32>
    %65 = vector.broadcast %64 : vector<9x1xf32> to vector<9x9xf32>
    %66 = arith.divf %62, %65 : vector<9x9xf32>
    %67 = arith.truncf %66 : vector<9x9xf32> to vector<9x9xbf16>
    %cst_23 = arith.constant dense<0.000000e+00> : vector<9x32xf32>
    %68 = tpu.matmul %67, %56, %cst_23 {dimension_numbers = #tpu.dot_dimension_numbers<[1], [0], [0], [1], [0, 0, 1, 1], [], []>} : vector<9x9xbf16>, vector<9x32xbf16>, vector<9x32xf32> -> vector<9x32xf32>
    %69 = arith.truncf %68 : vector<9x32xf32> to vector<9x32xbf16>
    %c32 = arith.constant 32 : index
    %c0_24 = arith.constant 0 : index
    %70 = vector.load %arg5[%c32, %c0_24] : memref<128x128xbf16, #tpu.memory_space<vmem>>, vector<32x128xbf16>
    %cst_25 = arith.constant dense<0.000000e+00> : vector<9x128xf32>
    %71 = tpu.matmul %69, %70, %cst_25 {dimension_numbers = #tpu.dot_dimension_numbers<[1], [0], [0], [1], [0, 0, 1, 1], [], []>} : vector<9x32xbf16>, vector<32x128xbf16>, vector<9x128xf32> -> vector<9x128xf32>
    %72 = arith.addf %50, %71 : vector<9x128xf32>
    %73 = vector.extract_strided_slice %29 {offsets = [0, 64], sizes = [9, 32], strides = [1, 1]} : vector<9x384xf32> to vector<9x32xf32>
    %74 = arith.truncf %73 : vector<9x32xf32> to vector<9x32xbf16>
    %75 = vector.extract_strided_slice %29 {offsets = [0, 192], sizes = [9, 32], strides = [1, 1]} : vector<9x384xf32> to vector<9x32xf32>
    %76 = arith.truncf %75 : vector<9x32xf32> to vector<9x32xbf16>
    %77 = vector.extract_strided_slice %29 {offsets = [0, 320], sizes = [9, 32], strides = [1, 1]} : vector<9x384xf32> to vector<9x32xf32>
    %78 = arith.truncf %77 : vector<9x32xf32> to vector<9x32xbf16>
    %cst_26 = arith.constant dense<0.000000e+00> : vector<9x9xf32>
    %79 = tpu.matmul %74, %76, %cst_26 {dimension_numbers = #tpu.dot_dimension_numbers<[1], [1], [0], [0], [0, 0, 1, 0], [], []>} : vector<9x32xbf16>, vector<9x32xbf16>, vector<9x9xf32> -> vector<9x9xf32>
    %cst_27 = arith.constant dense<0xFF800000> : vector<9xf32>
    %80 = vector.multi_reduction <maximumf>, %79, %cst_27 [1] : vector<9x9xf32> to vector<9xf32>
    %81 = vector.shape_cast %80 : vector<9xf32> to vector<9x1xf32>
    %82 = vector.broadcast %81 : vector<9x1xf32> to vector<9x9xf32>
    %83 = arith.subf %79, %82 : vector<9x9xf32>
    %84 = math.exp %83 : vector<9x9xf32>
    %cst_28 = arith.constant dense<0.000000e+00> : vector<9xf32>
    %85 = vector.multi_reduction <add>, %84, %cst_28 [1] : vector<9x9xf32> to vector<9xf32>
    %86 = vector.shape_cast %85 : vector<9xf32> to vector<9x1xf32>
    %87 = vector.broadcast %86 : vector<9x1xf32> to vector<9x9xf32>
    %88 = arith.divf %84, %87 : vector<9x9xf32>
    %89 = arith.truncf %88 : vector<9x9xf32> to vector<9x9xbf16>
    %cst_29 = arith.constant dense<0.000000e+00> : vector<9x32xf32>
    %90 = tpu.matmul %89, %78, %cst_29 {dimension_numbers = #tpu.dot_dimension_numbers<[1], [0], [0], [1], [0, 0, 1, 1], [], []>} : vector<9x9xbf16>, vector<9x32xbf16>, vector<9x32xf32> -> vector<9x32xf32>
    %91 = arith.truncf %90 : vector<9x32xf32> to vector<9x32xbf16>
    %c64 = arith.constant 64 : index
    %c0_30 = arith.constant 0 : index
    %92 = vector.load %arg5[%c64, %c0_30] : memref<128x128xbf16, #tpu.memory_space<vmem>>, vector<32x128xbf16>
    %cst_31 = arith.constant dense<0.000000e+00> : vector<9x128xf32>
    %93 = tpu.matmul %91, %92, %cst_31 {dimension_numbers = #tpu.dot_dimension_numbers<[1], [0], [0], [1], [0, 0, 1, 1], [], []>} : vector<9x32xbf16>, vector<32x128xbf16>, vector<9x128xf32> -> vector<9x128xf32>
    %94 = arith.addf %72, %93 : vector<9x128xf32>
    %95 = vector.extract_strided_slice %29 {offsets = [0, 96], sizes = [9, 32], strides = [1, 1]} : vector<9x384xf32> to vector<9x32xf32>
    %96 = arith.truncf %95 : vector<9x32xf32> to vector<9x32xbf16>
    %97 = vector.extract_strided_slice %29 {offsets = [0, 224], sizes = [9, 32], strides = [1, 1]} : vector<9x384xf32> to vector<9x32xf32>
    %98 = arith.truncf %97 : vector<9x32xf32> to vector<9x32xbf16>
    %99 = vector.extract_strided_slice %29 {offsets = [0, 352], sizes = [9, 32], strides = [1, 1]} : vector<9x384xf32> to vector<9x32xf32>
    %100 = arith.truncf %99 : vector<9x32xf32> to vector<9x32xbf16>
    %cst_32 = arith.constant dense<0.000000e+00> : vector<9x9xf32>
    %101 = tpu.matmul %96, %98, %cst_32 {dimension_numbers = #tpu.dot_dimension_numbers<[1], [1], [0], [0], [0, 0, 1, 0], [], []>} : vector<9x32xbf16>, vector<9x32xbf16>, vector<9x9xf32> -> vector<9x9xf32>
    %cst_33 = arith.constant dense<0xFF800000> : vector<9xf32>
    %102 = vector.multi_reduction <maximumf>, %101, %cst_33 [1] : vector<9x9xf32> to vector<9xf32>
    %103 = vector.shape_cast %102 : vector<9xf32> to vector<9x1xf32>
    %104 = vector.broadcast %103 : vector<9x1xf32> to vector<9x9xf32>
    %105 = arith.subf %101, %104 : vector<9x9xf32>
    %106 = math.exp %105 : vector<9x9xf32>
    %cst_34 = arith.constant dense<0.000000e+00> : vector<9xf32>
    %107 = vector.multi_reduction <add>, %106, %cst_34 [1] : vector<9x9xf32> to vector<9xf32>
    %108 = vector.shape_cast %107 : vector<9xf32> to vector<9x1xf32>
    %109 = vector.broadcast %108 : vector<9x1xf32> to vector<9x9xf32>
    %110 = arith.divf %106, %109 : vector<9x9xf32>
    %111 = arith.truncf %110 : vector<9x9xf32> to vector<9x9xbf16>
    %cst_35 = arith.constant dense<0.000000e+00> : vector<9x32xf32>
    %112 = tpu.matmul %111, %100, %cst_35 {dimension_numbers = #tpu.dot_dimension_numbers<[1], [0], [0], [1], [0, 0, 1, 1], [], []>} : vector<9x9xbf16>, vector<9x32xbf16>, vector<9x32xf32> -> vector<9x32xf32>
    %113 = arith.truncf %112 : vector<9x32xf32> to vector<9x32xbf16>
    %c96 = arith.constant 96 : index
    %c0_36 = arith.constant 0 : index
    %114 = vector.load %arg5[%c96, %c0_36] : memref<128x128xbf16, #tpu.memory_space<vmem>>, vector<32x128xbf16>
    %cst_37 = arith.constant dense<0.000000e+00> : vector<9x128xf32>
    %115 = tpu.matmul %113, %114, %cst_37 {dimension_numbers = #tpu.dot_dimension_numbers<[1], [0], [0], [1], [0, 0, 1, 1], [], []>} : vector<9x32xbf16>, vector<32x128xbf16>, vector<9x128xf32> -> vector<9x128xf32>
    %116 = arith.addf %94, %115 : vector<9x128xf32>
    %117 = arith.addf %2, %116 : vector<9x128xf32>
    %c0_38 = arith.constant 0 : index
    %c0_39 = arith.constant 0 : index
    %118 = vector.load %arg6[%c0_38, %c0_39] : memref<1x128xf32, #tpu.memory_space<vmem>>, vector<1x128xf32>
    %119 = vector.broadcast %118 : vector<1x128xf32> to vector<9x128xf32>
    %120 = arith.addf %117, %119 : vector<9x128xf32>
    %cst_40 = arith.constant dense<0.000000e+00> : vector<9xf32>
    %121 = vector.multi_reduction <add>, %120, %cst_40 [1] : vector<9x128xf32> to vector<9xf32>
    %122 = vector.shape_cast %121 : vector<9xf32> to vector<9x1xf32>
    %cst_41 = arith.constant 1.280000e+02 : f32
    %123 = vector.broadcast %cst_41 : f32 to vector<9x1xf32>
    %124 = arith.divf %122, %123 : vector<9x1xf32>
    %125 = vector.broadcast %124 : vector<9x1xf32> to vector<9x128xf32>
    %126 = arith.subf %120, %125 : vector<9x128xf32>
    %127 = arith.mulf %126, %126 : vector<9x128xf32>
    %cst_42 = arith.constant dense<0.000000e+00> : vector<9xf32>
    %128 = vector.multi_reduction <add>, %127, %cst_42 [1] : vector<9x128xf32> to vector<9xf32>
    %129 = vector.shape_cast %128 : vector<9xf32> to vector<9x1xf32>
    %cst_43 = arith.constant 1.280000e+02 : f32
    %130 = vector.broadcast %cst_43 : f32 to vector<9x1xf32>
    %131 = arith.divf %129, %130 : vector<9x1xf32>
    %132 = vector.broadcast %124 : vector<9x1xf32> to vector<9x128xf32>
    %133 = arith.subf %120, %132 : vector<9x128xf32>
    %cst_44 = arith.constant 9.99999997E-7 : f32
    %134 = vector.broadcast %cst_44 : f32 to vector<9x1xf32>
    %135 = arith.addf %131, %134 : vector<9x1xf32>
    %136 = math.rsqrt %135 : vector<9x1xf32>
    %137 = vector.broadcast %136 : vector<9x1xf32> to vector<9x128xf32>
    %138 = arith.mulf %133, %137 : vector<9x128xf32>
    %c0_45 = arith.constant 0 : index
    %c0_46 = arith.constant 0 : index
    %139 = vector.load %arg7[%c0_45, %c0_46] : memref<1x128xf32, #tpu.memory_space<vmem>>, vector<1x128xf32>
    %140 = vector.broadcast %139 : vector<1x128xf32> to vector<9x128xf32>
    %141 = arith.mulf %138, %140 : vector<9x128xf32>
    %c0_47 = arith.constant 0 : index
    %c0_48 = arith.constant 0 : index
    %142 = vector.load %arg8[%c0_47, %c0_48] : memref<1x128xf32, #tpu.memory_space<vmem>>, vector<1x128xf32>
    %143 = vector.broadcast %142 : vector<1x128xf32> to vector<9x128xf32>
    %144 = arith.addf %141, %143 : vector<9x128xf32>
    %145 = arith.truncf %144 : vector<9x128xf32> to vector<9x128xbf16>
    %c0_49 = arith.constant 0 : index
    %c0_50 = arith.constant 0 : index
    %146 = vector.load %arg9[%c0_49, %c0_50] : memref<128x512xbf16, #tpu.memory_space<vmem>>, vector<128x512xbf16>
    %cst_51 = arith.constant dense<0.000000e+00> : vector<9x512xf32>
    %147 = tpu.matmul %145, %146, %cst_51 {dimension_numbers = #tpu.dot_dimension_numbers<[1], [0], [0], [1], [0, 0, 1, 1], [], []>} : vector<9x128xbf16>, vector<128x512xbf16>, vector<9x512xf32> -> vector<9x512xf32>
    %c0_52 = arith.constant 0 : index
    %c0_53 = arith.constant 0 : index
    %148 = vector.load %arg10[%c0_52, %c0_53] : memref<1x512xf32, #tpu.memory_space<vmem>>, vector<1x512xf32>
    %149 = vector.broadcast %148 : vector<1x512xf32> to vector<9x512xf32>
    %150 = arith.addf %147, %149 : vector<9x512xf32>
    %cst_54 = arith.constant 5.000000e-01 : f32
    %151 = vector.broadcast %cst_54 : f32 to vector<9x512xf32>
    %152 = arith.mulf %151, %150 : vector<9x512xf32>
    %cst_55 = arith.constant 0.707106769 : f32
    %153 = vector.broadcast %cst_55 : f32 to vector<9x512xf32>
    %154 = arith.mulf %150, %153 : vector<9x512xf32>
    %155 = math.erf %154 : vector<9x512xf32>
    %cst_56 = arith.constant 1.000000e+00 : f32
    %156 = vector.broadcast %cst_56 : f32 to vector<9x512xf32>
    %157 = arith.addf %156, %155 : vector<9x512xf32>
    %158 = arith.mulf %152, %157 : vector<9x512xf32>
    %159 = arith.truncf %158 : vector<9x512xf32> to vector<9x512xbf16>
    %c0_57 = arith.constant 0 : index
    %c0_58 = arith.constant 0 : index
    %160 = vector.load %arg11[%c0_57, %c0_58] : memref<512x128xbf16, #tpu.memory_space<vmem>>, vector<512x128xbf16>
    %cst_59 = arith.constant dense<0.000000e+00> : vector<9x128xf32>
    %161 = tpu.matmul %159, %160, %cst_59 {dimension_numbers = #tpu.dot_dimension_numbers<[1], [0], [0], [1], [0, 0, 1, 1], [], []>} : vector<9x512xbf16>, vector<512x128xbf16>, vector<9x128xf32> -> vector<9x128xf32>
    %c0_60 = arith.constant 0 : index
    %c0_61 = arith.constant 0 : index
    %162 = vector.load %arg12[%c0_60, %c0_61] : memref<1x128xf32, #tpu.memory_space<vmem>>, vector<1x128xf32>
    %163 = vector.broadcast %162 : vector<1x128xf32> to vector<9x128xf32>
    %164 = arith.addf %161, %163 : vector<9x128xf32>
    %165 = arith.addf %120, %164 : vector<9x128xf32>
    %166 = arith.truncf %165 : vector<9x128xf32> to vector<9x128xbf16>
    %c0_62 = arith.constant 0 : index
    %c0_63 = arith.constant 0 : index
    %c0_64 = arith.constant 0 : index
    %167 = vector.load %arg13[%c0_62, %c0_63, %c0_64] : memref<1x9x128xbf16, #tpu.memory_space<vmem>>, vector<1x9x128xbf16>
    %168 = vector.shape_cast %167 : vector<1x9x128xbf16> to vector<9x128xbf16>
    %169 = vector.shape_cast %166 : vector<9x128xbf16> to vector<1x9x128xbf16>
    tpu.vector_store %arg13[%c0_62, %c0_63, %c0_64], %169 {strides = array<i32>} : memref<1x9x128xbf16, #tpu.memory_space<vmem>>, vector<1x9x128xbf16>,
    return
  }
  func.func @transform_0(%arg0: i32) -> (i32, i32, i32) {
    %c0_i32 = arith.constant 0 : i32
    %c0_i32_0 = arith.constant 0 : i32
    %c0_i32_1 = arith.constant 0 : i32
    return %arg0, %c0_i32, %c0_i32_0 : i32, i32, i32
  }
  func.func @transform_1(%arg0: i32) -> (i32, i32) {
    %c0_i32 = arith.constant 0 : i32
    %c0_i32_0 = arith.constant 0 : i32
    %c0_i32_1 = arith.constant 0 : i32
    return %c0_i32, %c0_i32_0 : i32, i32
  }
  func.func @transform_2(%arg0: i32) -> (i32, i32) {
    %c0_i32 = arith.constant 0 : i32
    %c0_i32_0 = arith.constant 0 : i32
    %c0_i32_1 = arith.constant 0 : i32
    return %c0_i32, %c0_i32_0 : i32, i32
  }
  func.func @transform_3(%arg0: i32) -> (i32, i32) {
    %c0_i32 = arith.constant 0 : i32
    %c0_i32_0 = arith.constant 0 : i32
    %c0_i32_1 = arith.constant 0 : i32
    return %c0_i32, %c0_i32_0 : i32, i32
  }
  func.func @transform_4(%arg0: i32) -> (i32, i32) {
    %c0_i32 = arith.constant 0 : i32
    %c0_i32_0 = arith.constant 0 : i32
    %c0_i32_1 = arith.constant 0 : i32
    return %c0_i32, %c0_i32_0 : i32, i32
  }
  func.func @transform_5(%arg0: i32) -> (i32, i32) {
    %c0_i32 = arith.constant 0 : i32
    %c0_i32_0 = arith.constant 0 : i32
    %c0_i32_1 = arith.constant 0 : i32
    return %c0_i32, %c0_i32_0 : i32, i32
  }
  func.func @transform_6(%arg0: i32) -> (i32, i32) {
    %c0_i32 = arith.constant 0 : i32
    %c0_i32_0 = arith.constant 0 : i32
    %c0_i32_1 = arith.constant 0 : i32
    return %c0_i32, %c0_i32_0 : i32, i32
  }
  func.func @transform_7(%arg0: i32) -> (i32, i32) {
    %c0_i32 = arith.constant 0 : i32
    %c0_i32_0 = arith.constant 0 : i32
    %c0_i32_1 = arith.constant 0 : i32
    return %c0_i32, %c0_i32_0 : i32, i32
  }
  func.func @transform_8(%arg0: i32) -> (i32, i32) {
    %c0_i32 = arith.constant 0 : i32
    %c0_i32_0 = arith.constant 0 : i32
    %c0_i32_1 = arith.constant 0 : i32
    return %c0_i32, %c0_i32_0 : i32, i32
  }
  func.func @transform_9(%arg0: i32) -> (i32, i32) {
    %c0_i32 = arith.constant 0 : i32
    %c0_i32_0 = arith.constant 0 : i32
    %c0_i32_1 = arith.constant 0 : i32
    return %c0_i32, %c0_i32_0 : i32, i32
  }
  func.func @transform_10(%arg0: i32) -> (i32, i32) {
    %c0_i32 = arith.constant 0 : i32
    %c0_i32_0 = arith.constant 0 : i32
    %c0_i32_1 = arith.constant 0 : i32
    return %c0_i32, %c0_i32_0 : i32, i32
  }
  func.func @transform_11(%arg0: i32) -> (i32, i32) {
    %c0_i32 = arith.constant 0 : i32
    %c0_i32_0 = arith.constant 0 : i32
    %c0_i32_1 = arith.constant 0 : i32
    return %c0_i32, %c0_i32_0 : i32, i32
  }
  func.func @transform_12(%arg0: i32) -> (i32, i32, i32) {
    %c0_i32 = arith.constant 0 : i32
    %c0_i32_0 = arith.constant 0 : i32
    %c0_i32_1 = arith.constant 0 : i32
    return %arg0, %c0_i32, %c0_i32_0 : i32, i32, i32
  }
}

</mosaic_0001>

<bundles_post_ra>
// kernel: encoder_forward.4
= control target key start
LH: loop header
LB: loop body
LE: loop exit
PB: predicated region body
PF: predicated region fallthrough
CT: control target
= control target key end

     0   :  { %s467_s12 = smov 0   ;;  %s533_s0 = inlined_call_operand.vmem [shape: f32[32,192], index: 0, kind: input, shape index: {}]   ;;  %s534_s1 = inlined_call_operand.vmem [shape: bf16[192,128], index: 1, kind: input, shape index: {}]   ;;  %s535_s2 = inlined_call_operand.vmem [shape: f32[1,128], index: 2, kind: input, shape index: {}]   ;;  %s536_s3 = inlined_call_operand.vmem [shape: f32[32,128], index: 3, kind: output, shape index: {}]  }
   0x1 LB: > { %s390_s13 = sadd.s32 4294967295, %s444_s12   ;;  %p394_p0 = scmp.ge.s32.totalorder %s444_s12, 1  ;;  %s444_s12 = sphi %s467_s12, %s13_s12  }
   0x2   : > { %p139_p1 = scmp.lt.s32.totalorder %s444_s12, 3 }
   0x4   : > { %p140_p2 = pnand %p394_p0, %p139_p1 }
   0x5   : > { %s395_s16 = sshll.u32 (!%p140_p2), %s390_s13, 1 }
   0x6   : > { %143 = sbr.rel (%p140_p2) target bundleno = 260 (0x104), region = 32  ;;  %p165_p3 = scmp.lt.s32.totalorder (!%p140_p2), %s395_s16, 3 }
   0xb   : > { %v426_v0 = vld [vmem:[%s534_s1 + $0x38] sm:$0xff]   ;;  %v446_v1 = vmov 0   ;;  %v427_v2 = vld [vmem:[%s534_s1 + $0x30] sm:$0xff]   ;;  %s538_s16 = smov (!%p165_p3, %s395_s16), 3  ;;  %v428_v3 = vld [vmem:[%s534_s1 + $0x28] sm:$0xff]   ;;  %vm287_vm0 = vcmask 523264  }
   0xc   : > { %291 = vmatprep.subr.bf16.mxu0 %v446_v1  ;;  %s416_s21 = sshll.u32 %s538_s16, 4  ;;  %v429_v4 = vld [vmem:[%s534_s1 + $0x20] sm:$0xff]   ;;  %v430_v8 = vld [vmem:[%s534_s1 + $0x18] sm:$0xff]   ;;  %v431_v9 = vld [vmem:[%s534_s1 + $0x10] sm:$0xff]   ;;  %s399_s18 = sshll.u32 %s538_s16, 3 }
   0xd   : > { %292 = vmatpush1.bf16.msra.mxu0 %v426_v0  ;;  %s490_s24 = scalar_lea.vmem %s533_s0, %s416_s21  ;;  %v432_v10 = vld [vmem:[%s534_s1 + $0x8] sm:$0xff]   ;;  %v433_v11 = vld [vmem:[%s534_s1] sm:$0xff]   ;;  %v434_v12 = vld [vmem:[%s534_s1 + $0x58] sm:$0xff]   ;;  %s175_s23 = scalar_lea.vmem %s536_s3, %s399_s18 }
   0xe   : > { %293 = vmatprep.subr.bf16.mxu0 %v446_v1  ;;  %v179_v5 = vld [vmem:[%s490_s24 + $0x8] sm:$0xff]  ;;  %v181_v6 = vld [vmem:[%s490_s24 + $0x18] sm:$0xff]  ;;  %v435_v13 = vld [vmem:[%s534_s1 + $0x50] sm:$0xff]  }
   0xf   : > { %v183_v7 = vpack.c.bf16 %v181_v6, %v179_v5  ;;  %v436_v14 = vld [vmem:[%s534_s1 + $0x48] sm:$0xff]   ;;  %v437_v15 = vld [vmem:[%s534_s1 + $0x40] sm:$0xff]   ;;  %v180_v17 = vld [vmem:[%s490_s24 + $0x10] sm:$0xff] }
  0x10   : > { %v178_v16 = vld [vmem:[%s490_s24] sm:$0xff] }
  0x11   : > { %294 = vmatpush1.bf16.msra.mxu0 %v427_v2  ;;  %413 = vmatprep.mubr.msk.bf16.mxu0 %vm287_vm0, %v183_v7  ;;  %v182_v18 = vpack.c.bf16 %v180_v17, %v178_v16  ;;  %v400_v19 = vld [vmem:[%s535_s2] ss:$0 sm:$0xff] }
  0x12   : > { %295 = vmatprep.subr.bf16.mxu0 %v446_v1 }
  0x15   : > { %296 = vmatpush1.bf16.msra.mxu0 %v428_v3 }
  0x16   : > { %297 = vmatprep.subr.bf16.mxu0 %v446_v1 }
  0x19   : > { %298 = vmatpush1.bf16.msra.mxu0 %v429_v4 }
  0x1a   : > { %299 = vmatprep.subr.bf16.mxu0 %v446_v1 }
  0x1d   : > { %300 = vmatpush1.bf16.msra.mxu0 %v430_v8 }
  0x1e   : > { %301 = vmatprep.subr.bf16.mxu0 %v446_v1 }
  0x21   : > { %302 = vmatpush1.bf16.msra.mxu0 %v431_v9 }
  0x22   : > { %303 = vmatprep.subr.bf16.mxu0 %v446_v1 }
  0x25   : > { %304 = vmatpush1.bf16.msra.mxu0 %v432_v10 }
  0x26   : > { %305 = vmatprep.subr.bf16.mxu0 %v446_v1 }
  0x29   : > { %306 = vmatpush1.bf16.msra.mxu0 %v433_v11 }
  0x2a   : > { %315 = vmatprep.subr.bf16.mxu0 %v446_v1 }
  0x2d   : > { %316 = vmatpush2.bf16.msra.mxu0 %v434_v12 }
  0x2e   : > { %317 = vmatprep.subr.bf16.mxu0 %v446_v1 }
  0x31   : > { %318 = vmatpush2.bf16.msra.mxu0 %v435_v13 }
  0x32   : > { %319 = vmatprep.subr.bf16.mxu0 %v446_v1 }
  0x35   : > { %320 = vmatpush2.bf16.msra.mxu0 %v436_v14 }
  0x36   : > { %321 = vmatprep.subr.bf16.mxu0 %v446_v1 }
  0x39   : > { %322 = vmatpush2.bf16.msra.mxu0 %v437_v15 }
  0x3c   : > { %324 = vmatmul.mubr.bf16.vlgmr.msra.gmra.mxu0 %v182_v18 }
  0xfc   : > { %v325_v20 = vpop.f32.mrf.mxu0 }
  0xfd   : > { %v326_v21 = vadd.f32 %v400_v19, %v325_v20 }
  0xfe   : > { %v327_v22 = vpop.f32.mrf.mxu0 }
  0xff   : > { %332 = vst [vmem:[%s175_s23] sm:$0xff] %v326_v21 }
 0x100   : > { %v328_v23 = vpop.f32.mrf.mxu0 }
 0x101   : > { %v329_v24 = vadd.f32 %v400_v19, %v328_v23 }
 0x102   : > { %v330_v25 = vpop.f32.mrf.mxu0 }
 0x103   : > { %333 = vst [vmem:[%s175_s23 + $0x8] sm:$0xff] %v329_v24 }
 0x104 PF: > { %s13_s12 = sadd.s32 1, %s444_s12  }
 0x105   : > { %p10_p4 = scmp.ge.s32.totalorder %s13_s12, 4  }
 0x107   :  { %12 = sbr.rel (!%p10_p4) target bundleno = 1 (0x1), region = 62 }

// kernel: encoder_forward.7
= control target key start
LH: loop header
LB: loop body
LE: loop exit
PB: predicated region body
PF: predicated region fallthrough
CT: control target
= control target key end

     0   :  { %s331_s12 = smov 0   ;;  %s360_s0 = inlined_call_operand.vmem [shape: bf16[2,9,128], index: 0, kind: input, shape index: {}]   ;;  %s361_s1 = inlined_call_operand.vmem [shape: f32[1,128], index: 1, kind: input, shape index: {}]   ;;  %s362_s2 = inlined_call_operand.vmem [shape: f32[1,128], index: 2, kind: input, shape index: {}]   ;;  %s363_s3 = inlined_call_operand.vmem [shape: f32[2,9,128], index: 3, kind: output, shape index: {}]  }
   0x1 LB: > { %s276_s13 = sadd.s32 4294967295, %s309_s12   ;;  %p280_p0 = scmp.ge.s32.totalorder %s309_s12, 1  ;;  %s309_s12 = sphi %s331_s12, %s13_s12  }
   0x2   : > { %p137_p1 = scmp.lt.s32.totalorder %s309_s12, 3 }
   0x4   : > { %p138_p2 = pnand %p280_p0, %p137_p1 }
   0x5   : > { %p161_p3 = scmp.lt.s32.totalorder (!%p138_p2), %s276_s13, 1 }
   0x6   : > { %141 = sbr.rel (%p138_p2) target bundleno = 333 (0x14d), region = 32 }
   0xb   : > { %s365_s13 = smov (!%p161_p3, %s276_s13), 1  ;;  %vm177_vm0 = vcmask 1040384   ;;  %v285_v21 = vld [vmem:[%s361_s1] ss:$0 sm:$0xff] }
   0xc   : > { %s289_s14 = sshll.u32 %s365_s13, 3  ;;  %s290_s20 = sshll.u32 %s365_s13, 4  ;;  %v286_v23 = vld [vmem:[%s362_s2] ss:$0 sm:$0xff] }
   0xd   : > { %s165_s17 = scalar_lea.vmem %s360_s0, %s289_s14  ;;  %s170_s25 = scalar_lea.vmem %s363_s3, %s290_s20 }
   0xe   : > { %v172_v0 = vld [vmem:[%s165_s17 + $0x4] sm:$0x1]  ;;  %v171_v2 = vld [vmem:[%s165_s17] sm:$0xf] }
   0xf   : > { %v174_v1 = vunpack.c.l.bf16 %v172_v0  ;;  %v173_v4 = vunpack.c.l.bf16 %v171_v2 }
  0x11   : > { %v178_v3 = vsel %vm177_vm0, %v174_v1, 0.0 }
  0x12   : > { %179 = vadd.xlane.f32.xlu0 %v178_v3 }
  0x16   : > { %175 = vadd.xlane.f32.xlu0 %v173_v4 }
  0x9b   : > { %v180_v5 = vpop.xlane.xlu0 %179 }
  0x9c   : > { %v183_v6 = vmul.f32 0.0078125, %v180_v5 }
  0x9e   : > { %v185_v9 = vsub.f32 %v174_v1, %v183_v6 }
  0x9f   : > { %v176_v7 = vpop.xlane.xlu0 %175 }
  0xa0   : > { %v182_v8 = vmul.f32 0.0078125, %v176_v7  ;;  %v187_v12 = vmul.f32 %v185_v9, %v185_v9 }
  0xa2   : > { %v184_v10 = vsub.f32 %v173_v4, %v182_v8  ;;  %v190_v13 = vsel %vm177_vm0, %v187_v12, 0.0 }
  0xa4   : > { %v186_v11 = vmul.f32 %v184_v10, %v184_v10 }
  0xa6   : > { %188 = vadd.xlane.f32.xlu1 %v186_v11 }
  0xaa   : > { %191 = vadd.xlane.f32.xlu1 %v190_v13 }
 0x12f   : > { %v189_v14 = vpop.xlane.xlu1 %188 }
 0x130   : > { %v193_v15 = vmul.f32 0.0078125, %v189_v14 }
 0x132   : > { %v195_v16 = vadd.f32 1e-06, %v193_v15 }
 0x133   : > { %v192_v17 = vpop.xlane.xlu1 %191 }
 0x134   : > { %299 = vrsqrt.f32 %v195_v16  ;;  %v194_v18 = vmul.f32 0.0078125, %v192_v17 }
 0x136   : > { %v196_v19 = vadd.f32 1e-06, %v194_v18 }
 0x138   : > { %301 = vrsqrt.f32 %v196_v19 }
 0x141   : > { %v300_v20 = vpop.eup %299 }
 0x142   : > { %v199_v22 = vmul.f32 %v300_v20, %v184_v10 }
 0x144   : > { %v208_v24 = vmul.f32 %v285_v21, %v199_v22 }
 0x145   : > { %v302_v25 = vpop.eup %301 }
 0x146   : > { %v217_v26 = vadd.f32 %v286_v23, %v208_v24  ;;  %v200_v27 = vmul.f32 %v302_v25, %v185_v9 }
 0x148   : > { %219 = vst [vmem:[%s170_s25] sm:$0xff] %v217_v26  ;;  %v209_v28 = vmul.f32 %v285_v21, %v200_v27 }
 0x14a   : > { %v218_v29 = vadd.f32 %v286_v23, %v209_v28 }
 0x14c   : > { %220 = vst [vmem:[%s170_s25 + $0x8] sm:$0x1] %v218_v29 }
 0x14d PF: > { %s13_s12 = sadd.s32 1, %s309_s12  }
 0x14e   : > { %p10_p4 = scmp.ge.s32.totalorder %s13_s12, 4  }
 0x150   :  { %12 = sbr.rel (!%p10_p4) target bundleno = 1 (0x1), region = 62 }

// kernel: encoder_forward.5
= control target key start
LH: loop header
LB: loop body
LE: loop exit
PB: predicated region body
PF: predicated region fallthrough
CT: control target
= control target key end

     0   :  { %s2853_s21 = smov 0   ;;  %s3361_s0 = inlined_call_operand.vmem [shape: bf16[2,9,128], index: 0, kind: input, shape index: {}]   ;;  %s3362_s1 = inlined_call_operand.vmem [shape: f32[1,128], index: 1, kind: input, shape index: {}]   ;;  %s3363_s2 = inlined_call_operand.vmem [shape: f32[1,128], index: 2, kind: input, shape index: {}]   ;;  %s3364_s3 = inlined_call_operand.vmem [shape: bf16[128,384], index: 3, kind: input, shape index: {}]   ;;  %s3365_s4 = inlined_call_operand.vmem [shape: bf16[128,128], index: 4, kind: input, shape index: {}]   ;;  %s3366_s5 = inlined_call_operand.vmem [shape: f32[1,128], index: 5, kind: input, shape index: {}]   ;;  %s3367_s6 = inlined_call_operand.vmem [shape: f32[1,128], index: 6, kind: input, shape index: {}]   ;;  %s3368_s7 = inlined_call_operand.vmem [shape: f32[1,128], index: 7, kind: input, shape index: {}]   ;;  %s3369_s8 = inlined_call_operand.vmem [shape: bf16[128,512], index: 8, kind: input, shape index: {}]   ;;  %s3370_s9 = inlined_call_operand.vmem [shape: f32[1,512], index: 9, kind: input, shape index: {}]   ;;  %s3371_s10 = inlined_call_operand.vmem [shape: bf16[512,128], index: 10, kind: input, shape index: {}]   ;;  %s3372_s11 = inlined_call_operand.vmem [shape: f32[1,128], index: 11, kind: input, shape index: {}]   ;;  %s3373_s12 = inlined_call_operand.vmem [shape: bf16[2,9,128], index: 12, kind: output, shape index: {}]  }
   0x1 LB: > { %s2270_s22 = sadd.s32 4294967295, %s2779_s21   ;;  %p2274_p0 = scmp.ge.s32.totalorder %s2779_s21, 1  ;;  %s2779_s21 = sphi %s2853_s21, %s22_s21  }
   0x2   : > { %p362_p1 = scmp.lt.s32.totalorder %s2779_s21, 3 }
   0x4   : > { %p363_p2 = pnand %p2274_p0, %p362_p1 }
   0x5   : > { %p404_p3 = scmp.lt.s32.totalorder (!%p363_p2), %s2270_s22, 1  ;;  %s2785_s16 = smov (!%p363_p2), 96  }
   0x6   : > { %366 = sbr.rel (%p363_p2) target bundleno = 3560 (0xde8), region = 68  ;;  %s2786_s17 = smov (!%p363_p2), 64  }
   0x7   : > { %s2787_s29 = smov (!%p363_p2), 32  }
   0xb   : > { %s3375_s22 = smov (!%p404_p3, %s2270_s22), 1  ;;  %vm421_vm0 = vcmask 1040384   ;;  %v2597_v5 = vld [vmem:[%s3364_s3 + $0xac] ss:$12 sps:$4 sm:$0xff]   ;;  %v2599_v6 = vld [vmem:[%s3364_s3 + $0xa8] ss:$12 sps:$4 sm:$0xff]  }
   0xc   : > { %s2397_s23 = sshll.u32 %s3375_s22, 3  ;;  %v2781_v7 = vmov 0.0   ;;  %v2600_v8 = vld [vmem:[%s3364_s3 + $0xb0] ss:$12 sps:$4 sm:$0xff]   ;;  %624 = vmatprep.subr.bf16.mxu0 %v2597_v5  ;;  %v2601_v18 = vld [vmem:[%s3364_s3 + $0x94] ss:$12 sps:$4 sm:$0xff]  }
   0xd   : > { %s408_s26 = scalar_lea.vmem %s3361_s0, %s2397_s23  ;;  %2482 = vmatprep.subr.bf16.mxu1 %v2781_v7  ;;  %625 = vmatpush1.bf16.msra.mxu0 %v2599_v6  ;;  %v2603_v19 = vld [vmem:[%s3364_s3 + $0x90] ss:$12 sps:$4 sm:$0xff]   ;;  %v2604_v20 = vld [vmem:[%s3364_s3 + $0x98] ss:$12 sps:$4 sm:$0xff]   ;;  %v2608_v23 = vld [vmem:[%s3364_s3 + $0x80] ss:$12 sps:$4 sm:$0xff]   ;;  %s413_s28 = scalar_lea.vmem %s3373_s12, %s2397_s23 }
   0xe   : > { %v416_v0 = vld [vmem:[%s408_s26 + $0x4] sm:$0x1]  ;;  %v415_v1 = vld [vmem:[%s408_s26] sm:$0xf]  ;;  %2483 = vmatpush3.bf16.msra.mxu1 %v2600_v8  ;;  %626 = vmatprep.subr.bf16.mxu0 %v2601_v18  ;;  %v2605_v21 = vld [vmem:[%s3364_s3 + $0x7c] ss:$12 sps:$4 sm:$0xff]  }
   0xf   : > { %v2869_v2 = vunpack.c.l.bf16 %v416_v0  ;;  %v2873_v4 = vunpack.c.l.bf16 %v415_v1  ;;  %2484 = vmatprep.subr.bf16.mxu1 %v2781_v7  ;;  %v2607_v22 = vld [vmem:[%s3364_s3 + $0x78] ss:$12 sps:$4 sm:$0xff]   ;;  %v2611_v25 = vld [vmem:[%s3364_s3 + $0x60] ss:$12 sps:$4 sm:$0xff]   ;;  %v2612_v26 = vld [vmem:[%s3364_s3 + $0x68] ss:$12 sps:$4 sm:$0xff]  }
  0x10   : > { %v2609_v24 = vld [vmem:[%s3364_s3 + $0x64] ss:$12 sps:$4 sm:$0xff]   ;;  %v2613_v27 = vld [vmem:[%s3364_s3 + $0x4c] ss:$12 sps:$4 sm:$0xff]   ;;  %v2615_v28 = vld [vmem:[%s3364_s3 + $0x48] ss:$12 sps:$4 sm:$0xff]  }
  0x11   : > { %v422_v3 = vsel %vm421_vm0, %v2869_v2, 0.0  ;;  %627 = vmatpush1.bf16.msra.mxu0 %v2603_v19  ;;  %v2616_v29 = vld [vmem:[%s3364_s3 + $0x50] ss:$12 sps:$4 sm:$0xff]   ;;  %v2617_v30 = vld [vmem:[%s3364_s3 + $0x34] ss:$12 sps:$4 sm:$0xff]   ;;  %v2782_v31 = vmov 0  }
  0x12   : > { %423 = vadd.xlane.f32.xlu0 %v422_v3  ;;  %2485 = vmatpush3.bf16.msra.mxu1 %v2604_v20  ;;  %vm2783_vm1 = vmmov 0   ;;  %v2619_v32 = vld [vmem:[%s3364_s3 + $0x30] ss:$12 sps:$4 sm:$0xff]   ;;  %v2620_v33 = vld [vmem:[%s3364_s3 + $0x38] ss:$12 sps:$4 sm:$0xff]   ;;  %vm787_vm2 = vcmask 1043456  }
  0x13   : > { %2486 = vmatprep.subr.bf16.mxu1 %v2781_v7  ;;  %628 = vmatprep.subr.bf16.mxu0 %v2605_v21  ;;  %v2621_v34 = vld [vmem:[%s3364_s3 + $0x1c] ss:$12 sps:$4 sm:$0xff]   ;;  %v2623_v35 = vld [vmem:[%s3364_s3 + $0x18] ss:$12 sps:$4 sm:$0xff]   ;;  %v2624_v36 = vld [vmem:[%s3364_s3 + $0x20] ss:$12 sps:$4 sm:$0xff]  }
  0x14   : > { %656 = vmatprep.mubr.bf16.mxu0 %v2782_v31  ;;  %2498 = vmatprep.mubr.msk.bf16.mxu1 %vm2783_vm1, %v2781_v7  ;;  %v2625_v37 = vld [vmem:[%s3364_s3 + $0x4] ss:$12 sps:$4 sm:$0xff]   ;;  %v2627_v38 = vld [vmem:[%s3364_s3] ss:$12 sps:$4 sm:$0xff]   ;;  %v2628_v39 = vld [vmem:[%s3364_s3 + $0x8] ss:$12 sps:$4 sm:$0xff]  }
  0x15   : > { %629 = vmatpush1.bf16.msra.mxu0 %v2607_v22  ;;  %v2279_v48 = vld [vmem:[%s3362_s1] ss:$0 sm:$0xff]  ;;  %vm788_vm3 = vcmask 1044480   ;;  %v2784_v59 = vmov 65535   ;;  %vm711_vm4 = vcmask 261120   ;;  %vm759_vm5 = vcmask 72704  }
  0x16   : > { %419 = vadd.xlane.f32.xlu0 %v2873_v4  ;;  %2487 = vmatpush3.bf16.msra.mxu1 %v2608_v23  ;;  %v2280_v52 = vld [vmem:[%s3363_s2] ss:$0 sm:$0xff]  ;;  %v789_v60 = vsel %vm787_vm2, 4294967295, %v2784_v59  ;;  %vm763_vm6 = vcmask 65536   ;;  %vm2210_vm7 = vsmask.f32 256 }
  0x17   : > { %2488 = vmatprep.subr.bf16.mxu1 %v2781_v7  ;;  %630 = vmatprep.subr.bf16.mxu0 %v2609_v24  ;;  %v2984_v1 = vsel %vm788_vm3, %v789_v60, 0  ;;  %vm2211_vm8 = vmand %vm421_vm0, %vm2210_vm7 }
  0x19   : > { %631 = vmatpush1.bf16.msra.mxu0 %v2611_v25 }
  0x1a   : > { %2489 = vmatpush3.bf16.msra.mxu1 %v2612_v26  ;;  %632 = vmatprep.subr.bf16.mxu0 %v2613_v27 }
  0x1b   : > { %2490 = vmatprep.subr.bf16.mxu1 %v2781_v7 }
  0x1d   : > { %633 = vmatpush1.bf16.msra.mxu0 %v2615_v28 }
  0x1e   : > { %2491 = vmatpush3.bf16.msra.mxu1 %v2616_v29  ;;  %634 = vmatprep.subr.bf16.mxu0 %v2617_v30 }
  0x1f   : > { %2492 = vmatprep.subr.bf16.mxu1 %v2781_v7 }
  0x21   : > { %635 = vmatpush1.bf16.msra.mxu0 %v2619_v32 }
  0x22   : > { %2493 = vmatpush3.bf16.msra.mxu1 %v2620_v33  ;;  %636 = vmatprep.subr.bf16.mxu0 %v2621_v34 }
  0x23   : > { %2494 = vmatprep.subr.bf16.mxu1 %v2781_v7 }
  0x25   : > { %637 = vmatpush1.bf16.msra.mxu0 %v2623_v35 }
  0x26   : > { %2495 = vmatpush3.bf16.msra.mxu1 %v2624_v36  ;;  %638 = vmatprep.subr.bf16.mxu0 %v2625_v37 }
  0x27   : > { %2496 = vmatprep.subr.bf16.mxu1 %v2781_v7 }
  0x29   : > { %639 = vmatpush1.bf16.msra.mxu0 %v2627_v38 }
  0x2a   : > { %2497 = vmatpush3.bf16.msra.mxu1 %v2628_v39  ;;  %2502 = vmatprep.subr.bf16.mxu0 %v2781_v7 }
  0x2b   : > { %2508 = vmatprep.subr.bf16.mxu1 %v2781_v7 }
  0x9b   : > { %v424_v9 = vpop.xlane.xlu0 %423 }
  0x9c   : > { %v427_v10 = vmul.f32 0.0078125, %v424_v9 }
  0x9e   : > { %v2888_v13 = vsub.f32 %v2869_v2, %v427_v10 }
  0x9f   : > { %v420_v11 = vpop.xlane.xlu0 %419 }
  0xa0   : > { %v426_v12 = vmul.f32 0.0078125, %v420_v11  ;;  %v431_v16 = vmul.f32 %v2888_v13, %v2888_v13 }
  0xa2   : > { %v2891_v14 = vsub.f32 %v2873_v4, %v426_v12  ;;  %v434_v17 = vsel %vm421_vm0, %v431_v16, 0.0 }
  0xa4   : > { %v430_v15 = vmul.f32 %v2891_v14, %v2891_v14 }
  0xa6   : > { %432 = vadd.xlane.f32.xlu1 %v430_v15 }
  0xaa   : > { %435 = vadd.xlane.f32.xlu1 %v434_v17 }
 0x12f   : > { %v433_v40 = vpop.xlane.xlu1 %432 }
 0x130   : > { %v437_v41 = vmul.f32 0.0078125, %v433_v40 }
 0x132   : > { %v439_v42 = vadd.f32 1e-06, %v437_v41 }
 0x133   : > { %v436_v43 = vpop.xlane.xlu1 %435 }
 0x134   : > { %2717 = vrsqrt.f32 %v439_v42  ;;  %v438_v44 = vmul.f32 0.0078125, %v436_v43 }
 0x136   : > { %v440_v45 = vadd.f32 1e-06, %v438_v44 }
 0x138   : > { %2719 = vrsqrt.f32 %v440_v45 }
 0x141   : > { %v2718_v46 = vpop.eup %2717 }
 0x142   : > { %v443_v47 = vmul.f32 %v2718_v46, %v2891_v14 }
 0x144   : > { %v452_v51 = vmul.f32 %v2279_v48, %v443_v47 }
 0x145   : > { %v2720_v49 = vpop.eup %2719 }
 0x146   : > { %v444_v50 = vmul.f32 %v2720_v49, %v2888_v13  ;;  %v461_v54 = vadd.f32 %v2280_v52, %v452_v51 }
 0x148   : > { %v453_v53 = vmul.f32 %v2279_v48, %v444_v50 }
 0x14a   : > { %v462_v55 = vadd.f32 %v2280_v52, %v453_v53 }
 0x14c   : > { %v463_v56 = vpack.c.bf16 %v462_v55, %v461_v54  ;;  %v2631_v55 = vld [vmem:[%s3365_s4 + $0x18] sm:$0xff]  }
 0x14e   : > { %657 = vmatmul.mubr.bf16.vlgmr.msra.gmra.mxu0 %v463_v56  ;;  %2499 = vmatmul.mubr.bf16.vlgmr.msra.gmra.mxu1 %v463_v56 }
 0x14f   : > { %2504 = vmatprep.mubr.msk.bf16.mxu0 %vm2783_vm1, %v2781_v7  ;;  %2510 = vmatprep.mubr.msk.bf16.mxu1 %vm2783_vm1, %v2781_v7 }
 0x20e   : > { %v658_v57 = vpop.f32.mrf.mxu0  ;;  %v701_v58 = vpop.f32.mrf.mxu1 }
 0x210   : > { %v660_v61 = vpop.f32.mrf.mxu0  ;;  %v2500_v62 = vpop.f32.mrf.mxu1 }
 0x212   : > { %v662_v63 = vpop.f32.mrf.mxu0  ;;  %v704_v0 = vpop.f32.mrf.mxu1 }
 0x213   : > { %v2986_v3 = vpack.c.bf16 %v662_v63, %v658_v57  ;;  %v2988_v5 = vpack.c.bf16 %v704_v0, %v701_v58  ;;  %v2629_v0 = vld [vmem:[%s3365_s4 + $0x8] sm:$0xff]  }
 0x214   : > { %v664_v6 = vpop.f32.mrf.mxu0  ;;  %v2501_v8 = vpop.f32.mrf.mxu1 }
 0x215   : > { %v2990_v9 = vpack.c.bf16 %v664_v6, %v660_v61  ;;  %841 = vrot.lane.b32.xlu1 %v2986_v3, %s2785_s16  ;;  %v792_v10 = vand.u32 %v2984_v1, %v2988_v5  ;;  %v2630_v8 = vld [vmem:[%s3365_s4] sm:$0xff]  }
 0x217   : > { %2509 = vmatpush3.bf16.msra.mxu1 %v792_v10  ;;  %844 = vrot.lane.b32.xlu0 %v2990_v9, %s2785_s16  ;;  %v716_v11 = vsel %vm711_vm4, %v2990_v9, 0  ;;  %v2632_v10 = vld [vmem:[%s3365_s4 + $0x10] sm:$0xff]  }
 0x218   : > { %2503 = vmatpush3.bf16.xpose.msra.mxu0 %v716_v11  ;;  %2520 = vmatprep.subr.bf16.mxu1 %v2781_v7 }
 0x219   : > { %2514 = vmatprep.subr.bf16.mxu0 %v2781_v7 }
 0x21f   : > { %2505 = vmatmul.mubr.msk.bf16.vlgmr.msra.gmra.mxu0 %vm711_vm4, %v2986_v3 }
 0x220   : > { %2516 = vmatprep.mubr.msk.bf16.mxu0 %vm2783_vm1, %v2781_v7 }
 0x287   : > { %v842_v14 = vpop.permute.xlu1 %841 }
 0x289   : > { %v845_v12 = vpop.permute.xlu0 %844 }
 0x28a   : > { %v850_v13 = vsel %vm711_vm4, %v845_v12, 0 }
 0x28b   : > { %2515 = vmatpush3.bf16.xpose.msra.mxu0 %v850_v13 }
 0x28c   : > { %2526 = vmatprep.subr.bf16.mxu0 %v2781_v7 }
 0x292   : > { %2517 = vmatmul.mubr.msk.bf16.vlgmr.msra.gmra.mxu0 %vm711_vm4, %v842_v14 }
 0x293   : > { %2530 = vmatprep.mubr.msk.bf16.mxu0 %vm2783_vm1, %v2781_v7  ;;  %2527 = vmatpush3.bf16.msra.mxu0 %v2631_v55 }
 0x294   : > { %2528 = vmatprep.subr.bf16.mxu0 %v2781_v7 }
 0x297   : > { %2529 = vmatpush3.bf16.msra.mxu0 %v2632_v10 }
 0x298   : > { %2542 = vmatprep.subr.bf16.mxu0 %v2781_v7 }
 0x2df   : > { %v752_v15 = vpop.f32.mrf.mxu0 }
 0x2e0   : > { %v760_v16 = vsel %vm759_vm5, %v752_v15, -inf }
 0x2e1   : > { %761 = vmax.xlane.f32.xlu1 %v760_v16  ;;  %v2506_v17 = vpop.f32.mrf.mxu0 }
 0x2e3   : > { %v755_v18 = vpop.f32.mrf.mxu0 }
 0x2e4   : > { %v764_v19 = vsel %vm763_vm6, %v755_v18, -inf }
 0x2e5   : > { %765 = vmax.xlane.f32.xlu0 %v764_v19  ;;  %v2507_v20 = vpop.f32.mrf.mxu0 }
 0x352   : > { %v886_v21 = vpop.f32.mrf.mxu0 }
 0x353   : > { %v893_v22 = vsel %vm759_vm5, %v886_v21, -inf }
 0x354   : > { %894 = vmax.xlane.f32.xlu0 %v893_v22  ;;  %v2518_v23 = vpop.f32.mrf.mxu0 }
 0x356   : > { %v889_v24 = vpop.f32.mrf.mxu0 }
 0x357   : > { %v896_v25 = vsel %vm763_vm6, %v889_v24, -inf }
 0x358   : > { %897 = vmax.xlane.f32.xlu1 %v896_v25  ;;  %v2519_v26 = vpop.f32.mrf.mxu0 }
 0x36a   : > { %v762_v27 = vpop.xlane.xlu1 %761 }
 0x36b   : > { %v767_v28 = vsub.f32 %v752_v15, %v762_v27 }
 0x36d   : > { %v769_v29 = vmul.f32 1.442695, %v767_v28 }
 0x36e   : > { %v766_v30 = vpop.xlane.xlu0 %765 }
 0x36f   : > { %2721 = vpow2.f32 %v769_v29  ;;  %v768_v32 = vsub.f32 %v755_v18, %v766_v30 }
 0x371   : > { %v771_v33 = vmul.f32 1.442695, %v768_v32 }
 0x373   : > { %2723 = vpow2.f32 %v771_v33 }
 0x37c   : > { %v2722_v34 = vpop.eup %2721 }
 0x37d   : > { %v773_v35 = vsel %vm759_vm5, %v2722_v34, 0.0 }
 0x37e   : > { %774 = vadd.xlane.f32.xlu0 %v773_v35 }
 0x380   : > { %v2724_v36 = vpop.eup %2723 }
 0x381   : > { %v776_v37 = vsel %vm763_vm6, %v2724_v36, 0.0 }
 0x382   : > { %777 = vadd.xlane.f32.xlu1 %v776_v37 }
 0x3dd   : > { %v895_v38 = vpop.xlane.xlu0 %894 }
 0x3de   : > { %v899_v39 = vsub.f32 %v886_v21, %v895_v38 }
 0x3e0   : > { %v901_v40 = vmul.f32 1.442695, %v899_v39 }
 0x3e1   : > { %v898_v41 = vpop.xlane.xlu1 %897 }
 0x3e2   : > { %2725 = vpow2.f32 %v901_v40  ;;  %v900_v42 = vsub.f32 %v889_v24, %v898_v41 }
 0x3e4   : > { %v903_v43 = vmul.f32 1.442695, %v900_v42 }
 0x3e6   : > { %2727 = vpow2.f32 %v903_v43 }
 0x3ef   : > { %v2726_v44 = vpop.eup %2725 }
 0x3f0   : > { %v905_v45 = vsel %vm759_vm5, %v2726_v44, 0.0 }
 0x3f1   : > { %906 = vadd.xlane.f32.xlu0 %v905_v45 }
 0x3f3   : > { %v2728_v46 = vpop.eup %2727 }
 0x3f4   : > { %v908_v47 = vsel %vm763_vm6, %v2728_v46, 0.0 }
 0x3f5   : > { %909 = vadd.xlane.f32.xlu1 %v908_v47 }
 0x406   : > { %1085 = vrot.lane.b32.xlu1 %v2990_v9, %s2786_s17 }
 0x407   : > { %917 = vrot.lane.b32.xlu0 %v2988_v5, %s2785_s16  ;;  %v775_v48 = vpop.xlane.xlu0 %774 }
 0x408   : > { %2729 = vrcp.f32 %v775_v48 }
 0x40a   : > { %1083 = vrot.lane.b32.xlu1 %v2986_v3, %s2786_s17 }
 0x40b   : > { %v778_v49 = vpop.xlane.xlu1 %777 }
 0x40c   : > { %2731 = vrcp.f32 %v778_v49 }
 0x415   : > { %v2730_v50 = vpop.eup %2729 }
 0x416   : > { %v780_v52 = vmul.f32 %v2730_v50, %v2722_v34 }
 0x419   : > { %v2732_v51 = vpop.eup %2731 }
 0x41a   : > { %v782_v53 = vmul.f32 %v2732_v51, %v2724_v36 }
 0x41c   : > { %v783_v54 = vpack.c.bf16 %v782_v53, %v780_v52 }
 0x41e   : > { %2511 = vmatmul.mubr.msk.bf16.vlgmr.msra.gmra.mxu1 %vm759_vm5, %v783_v54 }
 0x41f   : > { %2522 = vmatprep.mubr.msk.bf16.mxu1 %vm2783_vm1, %v2781_v7 }
 0x47a   : > { %v907_v56 = vpop.xlane.xlu0 %906 }
 0x47b   : > { %2733 = vrcp.f32 %v907_v56 }
 0x47e   : > { %v918_v57 = vpop.permute.xlu0 %917  ;;  %v910_v58 = vpop.xlane.xlu1 %909 }
 0x47f   : > { %v923_v59 = vand.u32 %v918_v57, %v2984_v1  ;;  %2735 = vrcp.f32 %v910_v58 }
 0x481   : > { %2521 = vmatpush3.bf16.msra.mxu1 %v923_v59  ;;  %v2633_v59 = vld [vmem:[%s3365_s4 + $0x28] sm:$0xff]  }
 0x482   : > { %2534 = vmatprep.subr.bf16.mxu1 %v2781_v7  ;;  %v1086_v18 = vpop.permute.xlu1 %1085 }
 0x483   : > { %v1091_v22 = vsel %vm711_vm4, %v1086_v18, 0 }
 0x486   : > { %v1084_v23 = vpop.permute.xlu1 %1083 }
 0x488   : > { %v2734_v60 = vpop.eup %2733 }
 0x489   : > { %v912_v62 = vmul.f32 %v2734_v60, %v2726_v44  ;;  %v2634_v60 = vld [vmem:[%s3365_s4 + $0x20] sm:$0xff]  }
 0x48c   : > { %v2736_v61 = vpop.eup %2735 }
 0x48d   : > { %v914_v63 = vmul.f32 %v2736_v61, %v2728_v46 }
 0x48f   : > { %v915_v6 = vpack.c.bf16 %v914_v63, %v912_v62 }
 0x491   : > { %2523 = vmatmul.mubr.msk.bf16.vlgmr.msra.gmra.mxu1 %vm759_vm5, %v915_v6 }
 0x492   : > { %2535 = vmatpush3.bf16.msra.mxu1 %v2629_v0  ;;  %2538 = vmatprep.mubr.msk.bf16.mxu1 %vm2783_vm1, %v2781_v7 }
 0x493   : > { %2536 = vmatprep.subr.bf16.mxu1 %v2781_v7 }
 0x496   : > { %2537 = vmatpush3.bf16.msra.mxu1 %v2630_v8 }
 0x497   : > { %2548 = vmatprep.subr.bf16.mxu1 %v2781_v7 }
 0x4de   : > { %v828_v11 = vpop.f32.mrf.mxu1 }
 0x4e0   : > { %v2512_v12 = vpop.f32.mrf.mxu1 }
 0x4e2   : > { %v831_v13 = vpop.f32.mrf.mxu1 }
 0x4e3   : > { %v835_v14 = vpack.c.bf16 %v831_v13, %v828_v11 }
 0x4e4   : > { %v2513_v15 = vpop.f32.mrf.mxu1 }
 0x4e5   : > { %2539 = vmatmul.mubr.msk.bf16.vlgmr.msra.gmra.mxu1 %vm711_vm4, %v835_v14 }
 0x4e6   : > { %2550 = vmatprep.mubr.msk.bf16.mxu1 %vm2783_vm1, %v2781_v7 }
 0x551   : > { %v959_v16 = vpop.f32.mrf.mxu1 }
 0x553   : > { %v2524_v17 = vpop.f32.mrf.mxu1 }
 0x555   : > { %v962_v19 = vpop.f32.mrf.mxu1 }
 0x556   : > { %v966_v20 = vpack.c.bf16 %v962_v19, %v959_v16 }
 0x557   : > { %v2525_v21 = vpop.f32.mrf.mxu1 }
 0x558   : > { %2531 = vmatmul.mubr.msk.bf16.vlgmr.msra.gmra.mxu0 %vm711_vm4, %v966_v20 }
 0x559   : > { %2543 = vmatpush3.bf16.xpose.msra.mxu0 %v1091_v22  ;;  %2544 = vmatprep.mubr.msk.bf16.mxu0 %vm2783_vm1, %v2781_v7 }
 0x55a   : > { %2554 = vmatprep.subr.bf16.mxu0 %v2781_v7 }
 0x560   : > { %2545 = vmatmul.mubr.msk.bf16.vlgmr.msra.gmra.mxu0 %vm711_vm4, %v1084_v23 }
 0x561   : > { %2558 = vmatprep.mubr.msk.bf16.mxu0 %vm2783_vm1, %v2781_v7  ;;  %2555 = vmatpush3.bf16.msra.mxu0 %v2633_v59 }
 0x562   : > { %2556 = vmatprep.subr.bf16.mxu0 %v2781_v7 }
 0x565   : > { %2557 = vmatpush3.bf16.msra.mxu0 %v2634_v60 }
 0x566   : > { %2568 = vmatprep.subr.bf16.mxu0 %v2781_v7 }
 0x5a5   : > { %v3060_v24 = vpop.f32.mrf.mxu1 }
 0x5a7   : > { %v2540_v25 = vpop.f32.mrf.mxu1 }
 0x5a9   : > { %v3062_v26 = vpop.f32.mrf.mxu1 }
 0x5ab   : > { %v2541_v27 = vpop.f32.mrf.mxu1 }
 0x618   : > { %v3064_v28 = vpop.f32.mrf.mxu0 }
 0x619   : > { %v1077_v27 = vadd.f32 %v3060_v24, %v3064_v28 }
 0x61a   : > { %v2532_v29 = vpop.f32.mrf.mxu0 }
 0x61c   : > { %v3066_v30 = vpop.f32.mrf.mxu0 }
 0x61e   : > { %v2533_v32 = vpop.f32.mrf.mxu0 }
 0x620   : > { %v1127_v33 = vpop.f32.mrf.mxu0 }
 0x621   : > { %v1134_v34 = vsel %vm759_vm5, %v1127_v33, -inf }
 0x622   : > { %1135 = vmax.xlane.f32.xlu1 %v1134_v34  ;;  %v2546_v35 = vpop.f32.mrf.mxu0  ;;  %v1080_v34 = vadd.f32 %v3062_v26, %v3066_v30  ;;  %v2635_v26 = vld [vmem:[%s3365_s4 + $0x38] sm:$0xff]  }
 0x624   : > { %v1130_v36 = vpop.f32.mrf.mxu0 }
 0x625   : > { %v1137_v37 = vsel %vm763_vm6, %v1130_v36, -inf }
 0x626   : > { %1138 = vmax.xlane.f32.xlu0 %v1137_v37  ;;  %v2547_v38 = vpop.f32.mrf.mxu0 }
 0x633   : > { %1157 = vrot.lane.b32.xlu1 %v2988_v5, %s2786_s17 }
 0x637   : > { %1269 = vrot.lane.b32.xlu1 %v2986_v3, %s2787_s29 }
 0x6ab   : > { %v1136_v39 = vpop.xlane.xlu1 %1135 }
 0x6ac   : > { %v1140_v40 = vsub.f32 %v1127_v33, %v1136_v39 }
 0x6ae   : > { %v1142_v41 = vmul.f32 1.442695, %v1140_v40 }
 0x6af   : > { %v1158_v42 = vpop.permute.xlu1 %1157  ;;  %v1139_v43 = vpop.xlane.xlu0 %1138 }
 0x6b0   : > { %2737 = vpow2.f32 %v1142_v41  ;;  %v1163_v44 = vand.u32 %v1158_v42, %v2984_v1  ;;  %v1141_v45 = vsub.f32 %v1130_v36, %v1139_v43 }
 0x6b2   : > { %v1144_v46 = vmul.f32 1.442695, %v1141_v45  ;;  %2549 = vmatpush3.bf16.msra.mxu1 %v1163_v44 }
 0x6b3   : > { %2562 = vmatprep.subr.bf16.mxu1 %v2781_v7 }
 0x6b4   : > { %2739 = vpow2.f32 %v1144_v46 }
 0x6bd   : > { %v2738_v47 = vpop.eup %2737 }
 0x6be   : > { %v1146_v48 = vsel %vm759_vm5, %v2738_v47, 0.0 }
 0x6bf   : > { %1147 = vadd.xlane.f32.xlu0 %v1146_v48 }
 0x6c1   : > { %v2740_v49 = vpop.eup %2739 }
 0x6c2   : > { %v1149_v3 = vsel %vm763_vm6, %v2740_v49, 0.0 }
 0x6c3   : > { %1150 = vadd.xlane.f32.xlu0 %v1149_v3 }
 0x6d9   : > { %1271 = vrot.lane.b32.xlu0 %v2990_v9, %s2787_s29  ;;  %v1270_v9 = vpop.permute.xlu1 %1269 }
 0x748   : > { %v1148_v50 = vpop.xlane.xlu0 %1147 }
 0x749   : > { %2741 = vrcp.f32 %v1148_v50 }
 0x74c   : > { %v1151_v51 = vpop.xlane.xlu0 %1150 }
 0x74d   : > { %2743 = vrcp.f32 %v1151_v51 }
 0x750   : > { %v1272_v56 = vpop.permute.xlu0 %1271 }
 0x751   : > { %v1277_v58 = vsel %vm711_vm4, %v1272_v56, 0 }
 0x756   : > { %v2742_v52 = vpop.eup %2741 }
 0x757   : > { %v1153_v54 = vmul.f32 %v2742_v52, %v2738_v47 }
 0x75a   : > { %v2744_v53 = vpop.eup %2743 }
 0x75b   : > { %v1155_v55 = vmul.f32 %v2744_v53, %v2740_v49  ;;  %v2325_v53 = vld [vmem:[%s3366_s5] ss:$0 sm:$0xff] }
 0x75d   : > { %v1156_v57 = vpack.c.bf16 %v1155_v55, %v1153_v54 }
 0x75f   : > { %2551 = vmatmul.mubr.msk.bf16.vlgmr.msra.gmra.mxu1 %vm759_vm5, %v1156_v57  ;;  %v2639_v57 = vld [vmem:[%s3369_s8 + $0xe4] ss:$16 sps:$4 sm:$0xff]  }
 0x760   : > { %2563 = vmatpush3.bf16.xpose.msra.mxu1 %v1277_v58  ;;  %2564 = vmatprep.mubr.msk.bf16.mxu1 %vm2783_vm1, %v2781_v7  ;;  %v2642_v58 = vld [vmem:[%s3369_s8 + $0xec] ss:$16 sps:$4 sm:$0xff]  }
 0x761   : > { %2574 = vmatprep.subr.bf16.mxu1 %v2781_v7 }
 0x767   : > { %2565 = vmatmul.mubr.msk.bf16.vlgmr.msra.gmra.mxu1 %vm711_vm4, %v1270_v9 }
 0x768   : > { %2578 = vmatprep.mubr.msk.bf16.mxu1 %vm2783_vm1, %v2781_v7  ;;  %2575 = vmatpush3.bf16.msra.mxu1 %v2635_v26 }
 0x769   : > { %2576 = vmatprep.subr.bf16.mxu1 %v2781_v7 }
 0x81f   : > { %v1199_v61 = vpop.f32.mrf.mxu1 }
 0x821   : > { %v2552_v62 = vpop.f32.mrf.mxu1 }
 0x823   : > { %v1202_v63 = vpop.f32.mrf.mxu1 }
 0x824   : > { %v1206_v0 = vpack.c.bf16 %v1202_v63, %v1199_v61 }
 0x825   : > { %v2553_v6 = vpop.f32.mrf.mxu1 }
 0x826   : > { %2559 = vmatmul.mubr.msk.bf16.vlgmr.msra.gmra.mxu0 %vm711_vm4, %v1206_v0 }
 0x827   : > { %v1313_v8 = vpop.f32.mrf.mxu1  ;;  %2570 = vmatprep.mubr.msk.bf16.mxu0 %vm2783_vm1, %v2781_v7 }
 0x828   : > { %v1320_v10 = vsel %vm759_vm5, %v1313_v8, -inf }
 0x829   : > { %1321 = vmax.xlane.f32.xlu1 %v1320_v10  ;;  %v2566_v11 = vpop.f32.mrf.mxu1  ;;  %v2645_v10 = vld [vmem:[%s3369_s8 + $0xc4] ss:$16 sps:$4 sm:$0xff]  }
 0x82a   : > { %v2648_v11 = vld [vmem:[%s3369_s8 + $0xcc] ss:$16 sps:$4 sm:$0xff]  }
 0x82b   : > { %v1316_v12 = vpop.f32.mrf.mxu1 }
 0x82c   : > { %v1323_v13 = vsel %vm763_vm6, %v1316_v12, -inf }
 0x82d   : > { %1324 = vmax.xlane.f32.xlu0 %v1323_v13  ;;  %v2567_v14 = vpop.f32.mrf.mxu1  ;;  %v2646_v13 = vld [vmem:[%s3369_s8 + $0xc8] ss:$16 sps:$4 sm:$0xff]  }
 0x82e   : > { %v2651_v14 = vld [vmem:[%s3369_s8 + $0xa4] ss:$16 sps:$4 sm:$0xff]  }
 0x8b2   : > { %v1322_v15 = vpop.xlane.xlu1 %1321 }
 0x8b3   : > { %v1326_v16 = vsub.f32 %v1313_v8, %v1322_v15  ;;  %v2654_v15 = vld [vmem:[%s3369_s8 + $0xac] ss:$16 sps:$4 sm:$0xff]  }
 0x8b5   : > { %v1328_v17 = vmul.f32 1.442695, %v1326_v16  ;;  %v2649_v16 = vld [vmem:[%s3369_s8 + $0xa0] ss:$16 sps:$4 sm:$0xff]  }
 0x8b6   : > { %v1325_v18 = vpop.xlane.xlu0 %1324 }
 0x8b7   : > { %2745 = vpow2.f32 %v1328_v17  ;;  %v1327_v19 = vsub.f32 %v1316_v12, %v1325_v18  ;;  %v2643_v12 = vld [vmem:[%s3369_s8 + $0xc0] ss:$16 sps:$4 sm:$0xff]   ;;  %v2652_v17 = vld [vmem:[%s3369_s8 + $0xa8] ss:$16 sps:$4 sm:$0xff]  }
 0x8b8   : > { %v2655_v18 = vld [vmem:[%s3369_s8 + $0x80] ss:$16 sps:$4 sm:$0xff]  }
 0x8b9   : > { %v1330_v20 = vmul.f32 1.442695, %v1327_v19  ;;  %v2657_v19 = vld [vmem:[%s3369_s8 + $0x84] ss:$16 sps:$4 sm:$0xff]  }
 0x8bb   : > { %2747 = vpow2.f32 %v1330_v20  ;;  %v2658_v20 = vld [vmem:[%s3369_s8 + $0x88] ss:$16 sps:$4 sm:$0xff]  }
 0x8c4   : > { %v2746_v21 = vpop.eup %2745 }
 0x8c5   : > { %v1332_v22 = vsel %vm759_vm5, %v2746_v21, 0.0 }
 0x8c6   : > { %1333 = vadd.xlane.f32.xlu0 %v1332_v22  ;;  %v2663_v22 = vld [vmem:[%s3369_s8 + $0x64] ss:$16 sps:$4 sm:$0xff]  }
 0x8c8   : > { %v2748_v23 = vpop.eup %2747 }
 0x8c9   : > { %v1335_v25 = vsel %vm763_vm6, %v2748_v23, 0.0 }
 0x8ca   : > { %1336 = vadd.xlane.f32.xlu1 %v1335_v25  ;;  %v2661_v25 = vld [vmem:[%s3369_s8 + $0x60] ss:$16 sps:$4 sm:$0xff]  }
 0x8dc   : > { %1343 = vrot.lane.b32.xlu0 %v2988_v5, %s2787_s29 }
 0x8e6   : > { %v1260_v29 = vpop.f32.mrf.mxu0 }
 0x8e7   : > { %v1267_v32 = vadd.f32 %v1260_v29, %v1077_v27  ;;  %v2664_v27 = vld [vmem:[%s3369_s8 + $0x68] ss:$16 sps:$4 sm:$0xff]   ;;  %v2669_v29 = vld [vmem:[%s3369_s8 + $0x44] ss:$16 sps:$4 sm:$0xff]  }
 0x8e8   : > { %v2560_v33 = vpop.f32.mrf.mxu0 }
 0x8e9   : > { %v2667_v33 = vld [vmem:[%s3369_s8 + $0x40] ss:$16 sps:$4 sm:$0xff]  }
 0x8ea   : > { %v1263_v35 = vpop.f32.mrf.mxu0 }
 0x8eb   : > { %v1268_v36 = vadd.f32 %v1263_v35, %v1080_v34  ;;  %v2670_v34 = vld [vmem:[%s3369_s8 + $0x48] ss:$16 sps:$4 sm:$0xff]   ;;  %v2675_v35 = vld [vmem:[%s3369_s8 + $0x24] ss:$16 sps:$4 sm:$0xff]  }
 0x8ec   : > { %v2561_v37 = vpop.f32.mrf.mxu0 }
 0x8ed   : > { %v2673_v37 = vld [vmem:[%s3369_s8 + $0x20] ss:$16 sps:$4 sm:$0xff]  }
 0x94f   : > { %v1334_v38 = vpop.xlane.xlu0 %1333 }
 0x950   : > { %2749 = vrcp.f32 %v1334_v38  ;;  %v2676_v38 = vld [vmem:[%s3369_s8 + $0x28] ss:$16 sps:$4 sm:$0xff]  }
 0x953   : > { %v1337_v39 = vpop.xlane.xlu1 %1336  ;;  %v1344_v40 = vpop.permute.xlu0 %1343 }
 0x954   : > { %2751 = vrcp.f32 %v1337_v39  ;;  %v1349_v41 = vand.u32 %v1344_v40, %v2984_v1  ;;  %v2636_v1 = vld [vmem:[%s3365_s4 + $0x30] sm:$0xff]   ;;  %v2684_v40 = vld [vmem:[%s3369_s8 + $0xc] ss:$16 sps:$4 sm:$0xff]  }
 0x955   : > { %2577 = vmatpush3.bf16.msra.mxu1 %v2636_v1  ;;  %v2681_v39 = vld [vmem:[%s3369_s8 + $0x4] ss:$16 sps:$4 sm:$0xff]  }
 0x956   : > { %2569 = vmatpush3.bf16.msra.mxu0 %v1349_v41  ;;  %1766 = vmatprep.subr.bf16.mxu1 %v2642_v58  ;;  %v2679_v41 = vld [vmem:[%s3369_s8] ss:$16 sps:$4 sm:$0xff]  }
 0x957   : > { %1723 = vmatprep.subr.bf16.mxu0 %v2639_v57  ;;  %v2690_v57 = vld [vmem:[%s3371_s10 + $0xf0] sm:$0xff]  }
 0x958   : > { %v2692_v58 = vld [vmem:[%s3371_s10 + $0xb0] sm:$0xff]  }
 0x95d   : > { %v2750_v5 = vpop.eup %2749 }
 0x95e   : > { %v1339_v24 = vmul.f32 %v2750_v5, %v2746_v21  ;;  %v2660_v21 = vld [vmem:[%s3369_s8 + $0x8c] ss:$16 sps:$4 sm:$0xff]   ;;  %v2682_v5 = vld [vmem:[%s3369_s8 + $0x8] ss:$16 sps:$4 sm:$0xff]  }
 0x961   : > { %v2752_v42 = vpop.eup %2751 }
 0x962   : > { %v1341_v28 = vmul.f32 %v2752_v42, %v2748_v23  ;;  %v2666_v23 = vld [vmem:[%s3369_s8 + $0x6c] ss:$16 sps:$4 sm:$0xff]  }
 0x964   : > { %v1342_v43 = vpack.c.bf16 %v1341_v28, %v1339_v24 }
 0x966   : > { %2571 = vmatmul.mubr.msk.bf16.vlgmr.msra.gmra.mxu0 %vm759_vm5, %v1342_v43 }
 0x967   : > { %1755 = vmatprep.mubr.bf16.mxu0 %v2782_v31 }
 0xa26   : > { %v1385_v30 = vpop.f32.mrf.mxu0 }
 0xa28   : > { %v2572_v44 = vpop.f32.mrf.mxu0 }
 0xa2a   : > { %v1388_v45 = vpop.f32.mrf.mxu0 }
 0xa2b   : > { %v1392_v46 = vpack.c.bf16 %v1388_v45, %v1385_v30  ;;  %v2326_v45 = vld [vmem:[%s3367_s6] ss:$0 sm:$0xff] }
 0xa2c   : > { %v2573_v47 = vpop.f32.mrf.mxu0 }
 0xa2d   : > { %2579 = vmatmul.mubr.msk.bf16.vlgmr.msra.gmra.mxu1 %vm711_vm4, %v1392_v46 }
 0xa2e   : > { %1798 = vmatprep.mubr.bf16.mxu1 %v2782_v31 }
 0xaed   : > { %v1446_v48 = vpop.f32.mrf.mxu1 }
 0xaee   : > { %v1453_v51 = vadd.f32 %v1446_v48, %v1267_v32  ;;  %v2672_v32 = vld [vmem:[%s3369_s8 + $0x4c] ss:$16 sps:$4 sm:$0xff]  }
 0xaef   : > { %v2580_v49 = vpop.f32.mrf.mxu1 }
 0xaf0   : > { %v1455_v55 = vadd.f32 %v1453_v51, %v2873_v4  ;;  %v2640_v4 = vld [vmem:[%s3369_s8 + $0xe8] ss:$16 sps:$4 sm:$0xff]   ;;  %v2327_v49 = vld [vmem:[%s3368_s7] ss:$0 sm:$0xff] }
 0xaf1   : > { %v1449_v3 = vpop.f32.mrf.mxu1  ;;  %1767 = vmatpush1.bf16.msra.mxu1 %v2640_v4  ;;  %v2691_v4 = vld [vmem:[%s3371_s10 + $0x30] sm:$0xff]  }
 0xaf2   : > { %v1454_v50 = vadd.f32 %v1449_v3, %v1268_v36  ;;  %v3130_v31 = vadd.f32 %v2325_v53, %v1455_v55  ;;  %1768 = vmatprep.subr.bf16.mxu1 %v2648_v11  ;;  %v2678_v36 = vld [vmem:[%s3369_s8 + $0x2c] ss:$16 sps:$4 sm:$0xff]  }
 0xaf3   : > { %v2581_v7 = vpop.f32.mrf.mxu1  ;;  %v2687_v55 = vld [vmem:[%s3371_s10 + $0x38] sm:$0xff]  }
 0xaf4   : > { %v1456_v52 = vadd.f32 %v1454_v50, %v2869_v2  ;;  %v2637_v2 = vld [vmem:[%s3369_s8 + $0xe0] ss:$16 sps:$4 sm:$0xff]   ;;  %v2703_v11 = vld [vmem:[%s3371_s10 + $0x18] sm:$0xff]  }
 0xaf5   : > { %1724 = vmatpush1.bf16.msra.mxu0 %v2637_v2  ;;  %1769 = vmatpush1.bf16.msra.mxu1 %v2646_v13  ;;  %v2689_v2 = vld [vmem:[%s3371_s10 + $0x70] sm:$0xff]  }
 0xaf6   : > { %v3125_v54 = vadd.f32 %v2325_v53, %v1456_v52  ;;  %1725 = vmatprep.subr.bf16.mxu0 %v2645_v10  ;;  %1770 = vmatprep.subr.bf16.mxu1 %v2654_v15  ;;  %v2685_v52 = vld [vmem:[%s3371_s10 + $0x78] sm:$0xff]   ;;  %v2705_v13 = vld [vmem:[%s3371_s10 + $0x50] sm:$0xff]  }
 0xaf7   : > { %v2686_v53 = vld [vmem:[%s3371_s10 + $0xf8] sm:$0xff]   ;;  %v2707_v15 = vld [vmem:[%s3371_s10 + $0x10] sm:$0xff]  }
 0xaf8   : > { %v1468_v56 = vsel %vm421_vm0, %v3125_v54, 0.0  ;;  %v2702_v10 = vld [vmem:[%s3371_s10 + $0xd8] sm:$0xff]  }
 0xaf9   : > { %1469 = vadd.xlane.f32.xlu1 %v1468_v56  ;;  %1726 = vmatpush1.bf16.msra.mxu0 %v2643_v12  ;;  %v2688_v56 = vld [vmem:[%s3371_s10 + $0xb8] sm:$0xff]  }
 0xafa   : > { %1727 = vmatprep.subr.bf16.mxu0 %v2651_v14  ;;  %1771 = vmatpush1.bf16.msra.mxu1 %v2652_v17  ;;  %v2704_v12 = vld [vmem:[%s3371_s10 + $0x98] sm:$0xff]   ;;  %v2706_v14 = vld [vmem:[%s3371_s10 + $0xd0] sm:$0xff]   ;;  %v2709_v17 = vld [vmem:[%s3371_s10 + $0x48] sm:$0xff]  }
 0xafb   : > { %1772 = vmatprep.subr.bf16.mxu1 %v2660_v21  ;;  %v2713_v21 = vld [vmem:[%s3371_s10 + $0x40] sm:$0xff]  }
 0xafd   : > { %1466 = vadd.xlane.f32.xlu1 %v3130_v31  ;;  %1728 = vmatpush1.bf16.msra.mxu0 %v2649_v16  ;;  %v2708_v16 = vld [vmem:[%s3371_s10 + $0x90] sm:$0xff]  }
 0xafe   : > { %1729 = vmatprep.subr.bf16.mxu0 %v2657_v19  ;;  %1773 = vmatpush1.bf16.msra.mxu1 %v2658_v20  ;;  %v2711_v19 = vld [vmem:[%s3371_s10 + $0x8] sm:$0xff]  }
 0xaff   : > { %1774 = vmatprep.subr.bf16.mxu1 %v2666_v23  ;;  %v2712_v20 = vld [vmem:[%s3371_s10 + $0x88] sm:$0xff]   ;;  %v2715_v23 = vld [vmem:[%s3371_s10] sm:$0xff]  }
 0xb01   : > { %1730 = vmatpush1.bf16.msra.mxu0 %v2655_v18  ;;  %v2710_v18 = vld [vmem:[%s3371_s10 + $0xc8] sm:$0xff]  }
 0xb02   : > { %1731 = vmatprep.subr.bf16.mxu0 %v2663_v22  ;;  %1775 = vmatpush1.bf16.msra.mxu1 %v2664_v27  ;;  %v2714_v22 = vld [vmem:[%s3371_s10 + $0xc0] sm:$0xff]   ;;  %v1543_v27 = vlaneseq }
 0xb03   : > { %1776 = vmatprep.subr.bf16.mxu1 %v2672_v32 }
 0xb05   : > { %1732 = vmatpush1.bf16.msra.mxu0 %v2661_v25  ;;  %v2716_v25 = vld [vmem:[%s3371_s10 + $0x80] sm:$0xff]  }
 0xb06   : > { %1733 = vmatprep.subr.bf16.mxu0 %v2669_v29  ;;  %1777 = vmatpush1.bf16.msra.mxu1 %v2670_v34  ;;  %v1544_v29 = vshrl.u32 %v1543_v27, 7  ;;  %v1541_v34 = vld [vmem:[%s3370_s9] sm:$0xf] }
 0xb07   : > { %1778 = vmatprep.subr.bf16.mxu1 %v2678_v36 }
 0xb08   : > { %v1545_v32 = vsub.s32 0, %v1544_v29  ;;  %v1557_v36 = vsub.s32 3, %v1544_v29 }
 0xb09   : > { %1734 = vmatpush1.bf16.msra.mxu0 %v2667_v33  ;;  %v1553_v33 = vsub.s32 2, %v1544_v29 }
 0xb0a   : > { %1735 = vmatprep.subr.bf16.mxu0 %v2675_v35  ;;  %1779 = vmatpush1.bf16.msra.mxu1 %v2676_v38  ;;  %v1549_v35 = vsub.s32 1, %v1544_v29 }
 0xb0b   : > { %1780 = vmatprep.subr.bf16.mxu1 %v2684_v40  ;;  %v1554_v38 = vrot.slane %v1541_v34, %v1553_v33 }
 0xb0d   : > { %1736 = vmatpush1.bf16.msra.mxu0 %v2673_v37  ;;  %v1546_v37 = vrot.slane %v1541_v34, %v1545_v32 }
 0xb0e   : > { %1737 = vmatprep.subr.bf16.mxu0 %v2681_v39  ;;  %1781 = vmatpush1.bf16.msra.mxu1 %v2682_v5  ;;  %v1558_v5 = vrot.slane %v1541_v34, %v1557_v36 }
 0xb0f   : > { %2460 = vmatprep.subr.bf16.mxu1 %v2686_v53 }
 0xb11   : > { %1738 = vmatpush1.bf16.msra.mxu0 %v2679_v41  ;;  %v1550_v41 = vrot.slane %v1541_v34, %v1549_v35 }
 0xb12   : > { %2438 = vmatprep.subr.bf16.mxu0 %v2685_v52 }
 0xb82   : > { %v1470_v9 = vpop.xlane.xlu1 %1469 }
 0xb83   : > { %v1472_v59 = vmul.f32 0.0078125, %v1470_v9  ;;  %v2693_v9 = vld [vmem:[%s3371_s10 + $0x68] sm:$0xff]  }
 0xb85   : > { %v3146_v62 = vsub.f32 %v3125_v54, %v1472_v59  ;;  %v2694_v59 = vld [vmem:[%s3371_s10 + $0xe8] sm:$0xff]  }
 0xb86   : > { %v1467_v60 = vpop.xlane.xlu1 %1466 }
 0xb87   : > { %v1471_v61 = vmul.f32 0.0078125, %v1467_v60  ;;  %v1476_v6 = vmul.f32 %v3146_v62, %v3146_v62  ;;  %v2695_v60 = vld [vmem:[%s3371_s10 + $0x28] sm:$0xff]  }
 0xb89   : > { %v3149_v63 = vsub.f32 %v3130_v31, %v1471_v61  ;;  %v1479_v8 = vsel %vm421_vm0, %v1476_v6, 0.0  ;;  %v2696_v61 = vld [vmem:[%s3371_s10 + $0xa8] sm:$0xff]   ;;  %v2700_v6 = vld [vmem:[%s3371_s10 + $0xa0] sm:$0xff]  }
 0xb8b   : > { %v1475_v0 = vmul.f32 %v3149_v63, %v3149_v63 }
 0xb8d   : > { %1477 = vadd.xlane.f32.xlu1 %v1475_v0  ;;  %v2699_v0 = vld [vmem:[%s3371_s10 + $0x20] sm:$0xff]  }
 0xb91   : > { %1480 = vadd.xlane.f32.xlu1 %v1479_v8  ;;  %v2701_v8 = vld [vmem:[%s3371_s10 + $0x58] sm:$0xff]  }
 0xc16   : > { %v1478_v42 = vpop.xlane.xlu1 %1477 }
 0xc17   : > { %v1482_v24 = vmul.f32 0.0078125, %v1478_v42 }
 0xc19   : > { %v1484_v28 = vadd.f32 1e-06, %v1482_v24 }
 0xc1a   : > { %v1481_v43 = vpop.xlane.xlu1 %1480 }
 0xc1b   : > { %2753 = vrsqrt.f32 %v1484_v28  ;;  %v1483_v26 = vmul.f32 0.0078125, %v1481_v43 }
 0xc1d   : > { %v1485_v1 = vadd.f32 1e-06, %v1483_v26 }
 0xc1f   : > { %2755 = vrsqrt.f32 %v1485_v1 }
 0xc28   : > { %v2754_v30 = vpop.eup %2753 }
 0xc29   : > { %v1488_v44 = vmul.f32 %v2754_v30, %v3149_v63  ;;  %v2698_v63 = vld [vmem:[%s3371_s10 + $0xe0] sm:$0xff]  }
 0xc2b   : > { %v1497_v48 = vmul.f32 %v2326_v45, %v1488_v44 }
 0xc2c   : > { %v2756_v46 = vpop.eup %2755 }
 0xc2d   : > { %v1489_v47 = vmul.f32 %v2756_v46, %v3146_v62  ;;  %v1506_v50 = vadd.f32 %v2327_v49, %v1497_v48  ;;  %v2697_v62 = vld [vmem:[%s3371_s10 + $0x60] sm:$0xff]  }
 0xc2f   : > { %v1498_v3 = vmul.f32 %v2326_v45, %v1489_v47 }
 0xc31   : > { %v1507_v51 = vadd.f32 %v2327_v49, %v1498_v3 }
 0xc33   : > { %v1508_v7 = vpack.c.bf16 %v1507_v51, %v1506_v50 }
 0xc35   : > { %1756 = vmatmul.mubr.bf16.vlgmr.msra.gmra.mxu0 %v1508_v7  ;;  %1799 = vmatmul.mubr.bf16.vlgmr.msra.gmra.mxu1 %v1508_v7 }
 0xc36   : > { %2439 = vmatpush3.bf16.msra.mxu0 %v2687_v55  ;;  %2461 = vmatpush3.bf16.msra.mxu1 %v2688_v56 }
 0xc37   : > { %2440 = vmatprep.subr.bf16.mxu0 %v2689_v2  ;;  %2462 = vmatprep.subr.bf16.mxu1 %v2690_v57 }
 0xc3a   : > { %2441 = vmatpush3.bf16.msra.mxu0 %v2691_v4  ;;  %2463 = vmatpush3.bf16.msra.mxu1 %v2692_v58 }
 0xc3b   : > { %2442 = vmatprep.subr.bf16.mxu0 %v2693_v9  ;;  %2464 = vmatprep.subr.bf16.mxu1 %v2694_v59 }
 0xc3e   : > { %2443 = vmatpush3.bf16.msra.mxu0 %v2695_v60  ;;  %2465 = vmatpush3.bf16.msra.mxu1 %v2696_v61 }
 0xc3f   : > { %2444 = vmatprep.subr.bf16.mxu0 %v2697_v62  ;;  %2466 = vmatprep.subr.bf16.mxu1 %v2698_v63 }
 0xc42   : > { %2445 = vmatpush3.bf16.msra.mxu0 %v2699_v0  ;;  %2467 = vmatpush3.bf16.msra.mxu1 %v2700_v6 }
 0xc43   : > { %2446 = vmatprep.subr.bf16.mxu0 %v2701_v8  ;;  %2468 = vmatprep.subr.bf16.mxu1 %v2702_v10 }
 0xc46   : > { %2447 = vmatpush3.bf16.msra.mxu0 %v2703_v11  ;;  %2469 = vmatpush3.bf16.msra.mxu1 %v2704_v12 }
 0xc47   : > { %2448 = vmatprep.subr.bf16.mxu0 %v2705_v13  ;;  %2470 = vmatprep.subr.bf16.mxu1 %v2706_v14 }
 0xc4a   : > { %2449 = vmatpush3.bf16.msra.mxu0 %v2707_v15  ;;  %2471 = vmatpush3.bf16.msra.mxu1 %v2708_v16 }
 0xc4b   : > { %2450 = vmatprep.subr.bf16.mxu0 %v2709_v17  ;;  %2472 = vmatprep.subr.bf16.mxu1 %v2710_v18 }
 0xc4e   : > { %2451 = vmatpush3.bf16.msra.mxu0 %v2711_v19  ;;  %2473 = vmatpush3.bf16.msra.mxu1 %v2712_v20 }
 0xc4f   : > { %2452 = vmatprep.subr.bf16.mxu0 %v2713_v21  ;;  %2474 = vmatprep.subr.bf16.mxu1 %v2714_v22 }
 0xc52   : > { %2453 = vmatpush3.bf16.msra.mxu0 %v2715_v23  ;;  %2475 = vmatpush3.bf16.msra.mxu1 %v2716_v25 }
 0xcf5   : > { %v1757_v39 = vpop.f32.mrf.mxu0  ;;  %v1800_v40 = vpop.f32.mrf.mxu1 }
 0xcf6   : > { %v1758_v42 = vadd.f32 %v1757_v39, %v1546_v37  ;;  %v1801_v24 = vadd.f32 %v1800_v40, %v1554_v38 }
 0xcf7   : > { %v1759_v28 = vpop.f32.mrf.mxu0  ;;  %v1802_v43 = vpop.f32.mrf.mxu1 }
 0xcf8   : > { %v1817_v26 = vmul.f32 0.70710677, %v1758_v42  ;;  %v1819_v1 = vmul.f32 0.70710677, %v1801_v24  ;;  %v1760_v30 = vadd.f32 %v1759_v28, %v1550_v41  ;;  %v1803_v44 = vadd.f32 %v1802_v43, %v1558_v5 }
 0xcf9   : > { %v1761_v45 = vpop.f32.mrf.mxu0  ;;  %v1804_v46 = vpop.f32.mrf.mxu1  ;;  %v1809_v61 = vmul.f32 0.5, %v1758_v42  ;;  %v1811_v22 = vmul.f32 0.5, %v1801_v24 }
 0xcfa   : > { %v1762_v47 = vadd.f32 %v1761_v45, %v1546_v37  ;;  %v1805_v48 = vadd.f32 %v1804_v46, %v1554_v38  ;;  %2757 = verf.f32 %v1817_v26  ;;  %v1818_v49 = vmul.f32 0.70710677, %v1760_v30 }
 0xcfb   : > { %v1763_v3 = vpop.f32.mrf.mxu0  ;;  %v1806_v50 = vpop.f32.mrf.mxu1  ;;  %2759 = verf.f32 %v1819_v1  ;;  %v1820_v51 = vmul.f32 0.70710677, %v1803_v44  ;;  %v1810_v62 = vmul.f32 0.5, %v1760_v30  ;;  %v1812_v18 = vmul.f32 0.5, %v1803_v44 }
 0xcfc   : > { %v1821_v7 = vmul.f32 0.70710677, %v1762_v47  ;;  %2761 = verf.f32 %v1818_v49  ;;  %v1823_v52 = vmul.f32 0.70710677, %v1805_v48  ;;  %v1764_v53 = vadd.f32 %v1763_v3, %v1550_v41  ;;  %v2360_v41 = vld [vmem:[%s3372_s11] ss:$0 sm:$0xff] }
 0xcfd   : > { %v1807_v55 = vadd.f32 %v1806_v50, %v1558_v5  ;;  %2763 = verf.f32 %v1820_v51  ;;  %v1813_v11 = vmul.f32 0.5, %v1762_v47  ;;  %v1815_v15 = vmul.f32 0.5, %v1805_v48 }
 0xcfe   : > { %2765 = verf.f32 %v1821_v7  ;;  %v1822_v56 = vmul.f32 0.70710677, %v1764_v53  ;;  %v1814_v16 = vmul.f32 0.5, %v1764_v53  ;;  %v2212_v7 = vld [vmem:[%s413_s28 + $0x4] sm:$0x1] }
 0xcff   : > { %2767 = verf.f32 %v1823_v52  ;;  %v1824_v2 = vmul.f32 0.70710677, %v1807_v55  ;;  %v1816_v20 = vmul.f32 0.5, %v1807_v55 }
 0xd00   : > { %2769 = verf.f32 %v1822_v56 }
 0xd01   : > { %2771 = verf.f32 %v1824_v2 }
 0xd07   : > { %v2758_v57 = vpop.eup %2757 }
 0xd08   : > { %v2760_v4 = vpop.eup %2759  ;;  %v1833_v8 = vadd.f32 1.0, %v2758_v57 }
 0xd09   : > { %v2762_v58 = vpop.eup %2761  ;;  %v1835_v14 = vadd.f32 1.0, %v2760_v4 }
 0xd0a   : > { %v2764_v9 = vpop.eup %2763  ;;  %v1834_v63 = vadd.f32 1.0, %v2762_v58  ;;  %v1841_v29 = vmul.f32 %v1833_v8, %v1809_v61 }
 0xd0b   : > { %v2766_v59 = vpop.eup %2765  ;;  %v1836_v10 = vadd.f32 1.0, %v2764_v9  ;;  %v1843_v34 = vmul.f32 %v1835_v14, %v1811_v22 }
 0xd0c   : > { %v2768_v60 = vpop.eup %2767  ;;  %v1837_v0 = vadd.f32 1.0, %v2766_v59  ;;  %v1842_v23 = vmul.f32 %v1834_v63, %v1810_v62 }
 0xd0d   : > { %v2770_v6 = vpop.eup %2769  ;;  %v1839_v12 = vadd.f32 1.0, %v2768_v60  ;;  %v1844_v32 = vmul.f32 %v1836_v10, %v1812_v18 }
 0xd0e   : > { %v2772_v13 = vpop.eup %2771  ;;  %v1838_v17 = vadd.f32 1.0, %v2770_v6  ;;  %v1845_v19 = vmul.f32 %v1837_v0, %v1813_v11 }
 0xd0f   : > { %v1840_v21 = vadd.f32 1.0, %v2772_v13  ;;  %v1847_v25 = vmul.f32 %v1839_v12, %v1815_v15 }
 0xd10   : > { %v1846_v27 = vmul.f32 %v1838_v17, %v1814_v16  ;;  %v1849_v36 = vpack.c.bf16 %v1845_v19, %v1841_v29 }
 0xd11   : > { %v1848_v33 = vmul.f32 %v1840_v21, %v1816_v20  ;;  %v1851_v38 = vpack.c.bf16 %v1847_v25, %v1843_v34 }
 0xd12   : > { %v1850_v35 = vpack.c.bf16 %v1846_v27, %v1842_v23 }
 0xd13   : > { %v1852_v37 = vpack.c.bf16 %v1848_v33, %v1844_v32 }
 0xd14   : > { %2148 = vmatprep.mubr.bf16.mxu0 %v1850_v35 }
 0xd15   : > { %2189 = vmatprep.mubr.bf16.mxu1 %v1852_v37  ;;  %2149 = vmatmul.mubr.bf16.vlgmr.msra.gmra.mxu0 %v1849_v36 }
 0xd16   : > { %2190 = vmatmul.mubr.bf16.vlgmr.msra.gmra.mxu1 %v1851_v38 }
 0xdd5   : > { %v2454_v39 = vpop.f32.mrf.mxu0 }
 0xdd6   : > { %v2476_v40 = vpop.f32.mrf.mxu1 }
 0xdd7   : > { %v2455_v5 = vpop.f32.mrf.mxu0 }
 0xdd8   : > { %v2456_v42 = vadd.f32 %v2455_v5, %v2454_v39  ;;  %v2477_v24 = vpop.f32.mrf.mxu1 }
 0xdd9   : > { %v2457_v28 = vpop.f32.mrf.mxu0  ;;  %v2478_v26 = vadd.f32 %v2477_v24, %v2476_v40 }
 0xdda   : > { %v2151_v43 = vadd.f32 %v2456_v42, %v2360_v41  ;;  %v2479_v1 = vpop.f32.mrf.mxu1 }
 0xddb   : > { %v2458_v30 = vpop.f32.mrf.mxu0 }
 0xddc   : > { %v2192_v44 = vadd.f32 %v2478_v26, %v2151_v43  ;;  %v2459_v45 = vadd.f32 %v2458_v30, %v2457_v28  ;;  %v2480_v46 = vpop.f32.mrf.mxu1 }
 0xddd   : > { %v2481_v49 = vadd.f32 %v2480_v46, %v2479_v1 }
 0xdde   : > { %v2198_v47 = vadd.f32 %v2192_v44, %v3130_v31  ;;  %v2154_v48 = vadd.f32 %v2459_v45, %v2360_v41 }
 0xde0   : > { %v2399_v3 = vpack.c.bf16 %v2198_v47, %v2198_v47  ;;  %v2195_v50 = vadd.f32 %v2481_v49, %v2154_v48 }
 0xde2   : > { %2208 = vst [vmem:[%s413_s28] sm:$0xf] %v2399_v3  ;;  %v2199_v51 = vadd.f32 %v2195_v50, %v3125_v54 }
 0xde4   : > { %v2400_v52 = vpack.c.bf16 %v2199_v51, %v2199_v51 }
 0xde6   : > { %v2213_v53 = vsel %vm2211_vm8, %v2400_v52, %v2212_v7 }
 0xde7   : > { %2214 = vst [vmem:[%s413_s28 + $0x4] sm:$0x1] %v2213_v53 }
 0xde8 PF: > { %s22_s21 = sadd.s32 1, %s2779_s21  }
 0xde9   : > { %p19_p4 = scmp.ge.s32.totalorder %s22_s21, 4  }
 0xdeb   :  { %21 = sbr.rel (!%p19_p4) target bundleno = 1 (0x1), region = 98 }

</bundles_post_ra>
